<compile_context>
chip_gen: v7x
topology: tpu7x:2x2x1
jax: 0.10.0
libtpu: 0.0.40
codegen_flags: <defaults>
</compile_context>

<pallas_src>
import jax
import jax.numpy as jnp
from jax import lax
from jax.experimental import pallas as pl
from jax.experimental.pallas import tpu as pltpu

B = 8          # batch (independent DEQ instances could be stacked here up to
               # 128/256 MXU rows for throughput; kept small for the example)
N_IN = 4       # input features (e.g. VdP forcing / time embedding)
N_STATES = 32  # f.n_states
MAX_ITER = 60  # solver iterations
EPS = 1e-8


def deq_kernel(x_ref, wx_ref, wz_ref, b_ref, z_ref, res_ref):
    """Fixed-point solve of z = tanh(z @ Wz + x @ Wx + b) entirely in VMEM."""
    x = x_ref[...]
    wx = wx_ref[...]
    wz = wz_ref[...]
    b = b_ref[...]

    # Input injection is loop-invariant: compute once.
    u = jnp.dot(x, wx, preferred_element_type=jnp.float32) + b  # (B, N_STATES)

    z0 = jnp.zeros((B, N_STATES), dtype=jnp.float32)

    # Pure matmul + tanh body; residual hoisted out of the loop.  Fully
    # unrolled (MAX_ITER is a compile-time constant, body is tiny) so the
    # scheduler sees the whole dependence chain.
    def body(_, z):
        return jnp.tanh(jnp.dot(z, wz, preferred_element_type=jnp.float32) + u)

    z_prev = lax.fori_loop(0, MAX_ITER - 1, body, z0, unroll=True)

    # Final iteration done explicitly so forward_res matches the reference
    # solver's metric: ||z_K - z_{K-1}|| / (||z_K|| + eps).
    z_star = jnp.tanh(jnp.dot(z_prev, wz, preferred_element_type=jnp.float32) + u)
    diff = z_star - z_prev
    res = jnp.sqrt(jnp.sum(diff * diff)) / (jnp.sqrt(jnp.sum(z_star * z_star)) + EPS)

    z_ref[...] = z_star
    res_ref[0, 0] = res
    # TODO(synk): training-mode implicit-diff backward hook (autograd.grad +
    # second fixed-point solve on the adjoint) has no forward-pass Pallas
    # equivalent; inference path only.


def deq_forward(x, wx, wz, b):
    """Wrapper: returns (z_star, forward_res)."""
    bytes_accessed = 4 * (
        B * N_IN + N_IN * N_STATES + N_STATES * N_STATES + N_STATES
        + B * N_STATES + 1
    )
    cost = pl.CostEstimate(
        flops=2 * MAX_ITER * B * N_STATES * N_STATES + 2 * B * N_IN * N_STATES,
        transcendentals=MAX_ITER * B * N_STATES,
        bytes_accessed=bytes_accessed,
    )
    return pl.pallas_call(
        deq_kernel,
        out_shape=(
            jax.ShapeDtypeStruct((B, N_STATES), jnp.float32),
            jax.ShapeDtypeStruct((1, 1), jnp.float32),
        ),
        in_specs=[
            pl.BlockSpec(memory_space=pltpu.MemorySpace.VMEM),  # x
            pl.BlockSpec(memory_space=pltpu.MemorySpace.VMEM),  # Wx
            pl.BlockSpec(memory_space=pltpu.MemorySpace.VMEM),  # Wz
            pl.BlockSpec(memory_space=pltpu.MemorySpace.VMEM),  # b
        ],
        out_specs=(
            pl.BlockSpec(memory_space=pltpu.MemorySpace.VMEM),  # z_star
            pl.BlockSpec(memory_space=pltpu.MemorySpace.SMEM),  # forward_res scalar
        ),
        cost_estimate=cost,
    )(x, wx, wz, b)


def init_params(key):
    """Deterministic nn.Linear-style init; Wz scaled to guarantee contraction."""
    k1, k2, k3 = jax.random.split(key, 3)
    lim_x = 1.0 / jnp.sqrt(jnp.float32(N_IN))
    lim_z = 1.0 / jnp.sqrt(jnp.float32(N_STATES))
    wx = jax.random.uniform(k1, (N_IN, N_STATES), jnp.float32, -lim_x, lim_x)
    wz = 0.5 * jax.random.uniform(
        k2, (N_STATES, N_STATES), jnp.float32, -lim_z, lim_z
    )
    b = jax.random.uniform(k3, (1, N_STATES), jnp.float32, -lim_z, lim_z)
    return wx, wz, b


def deq_reference(x, wx, wz, b):
    """Pure-JAX reference of the same solver (returns z_star and forward_res)."""
    u = x @ wx + b
    z = jnp.zeros((B, N_STATES), jnp.float32)
    z_prev = z
    for _ in range(MAX_ITER):
        z_prev = z
        z = jnp.tanh(z @ wz + u)
    diff = z - z_prev
    res = jnp.sqrt(jnp.sum(diff * diff)) / (jnp.sqrt(jnp.sum(z * z)) + EPS)
    return z, res


if __name__ == "__main__":
    key = jax.random.PRNGKey(0)
    k_x, k_p = jax.random.split(key)
    x = jax.random.normal(k_x, (B, N_IN), jnp.float32)
    wx, wz, b = init_params(k_p)

    z_star, fwd_res = deq_forward(x, wx, wz, b)
    jax.block_until_ready(z_star)
    jax.block_until_ready(fwd_res)

    z_ref, res_ref_val = deq_reference(x, wx, wz, b)
    assert jnp.allclose(z_star, z_ref, atol=1e-5, rtol=1e-5), "z mismatch vs JAX ref"
    assert jnp.allclose(fwd_res[0, 0], res_ref_val, atol=1e-6, rtol=1e-4), (
        "forward_res mismatch vs JAX ref"
    )
    assert float(fwd_res[0, 0]) < 1e-4, "fixed point did not converge"

    print("KERNEL_OK")
</pallas_src>

<mosaic_0001>
module attributes {stable_mosaic.version = 11 : i64} {
  func.func @deq_kernel(%arg0: memref<8x4xf32, #tpu.memory_space<vmem>>, %arg1: memref<4x32xf32, #tpu.memory_space<vmem>>, %arg2: memref<32x32xf32, #tpu.memory_space<vmem>>, %arg3: memref<1x32xf32, #tpu.memory_space<vmem>>, %arg4: memref<8x32xf32, #tpu.memory_space<vmem>>, %arg5: memref<1x1xf32, #tpu.memory_space<smem>>) attributes {dimension_semantics = [], scalar_prefetch = 0 : i64, scratch_operands = 0 : i64, tpu.core_type = #tpu.core_type<tc>} {
    %c0 = arith.constant 0 : index
    %c0_0 = arith.constant 0 : index
    %0 = vector.load %arg0[%c0, %c0_0] : memref<8x4xf32, #tpu.memory_space<vmem>>, vector<8x4xf32>
    %c0_1 = arith.constant 0 : index
    %c0_2 = arith.constant 0 : index
    %1 = vector.load %arg1[%c0_1, %c0_2] : memref<4x32xf32, #tpu.memory_space<vmem>>, vector<4x32xf32>
    %c0_3 = arith.constant 0 : index
    %c0_4 = arith.constant 0 : index
    %2 = vector.load %arg2[%c0_3, %c0_4] : memref<32x32xf32, #tpu.memory_space<vmem>>, vector<32x32xf32>
    %c0_5 = arith.constant 0 : index
    %c0_6 = arith.constant 0 : index
    %3 = vector.load %arg3[%c0_5, %c0_6] : memref<1x32xf32, #tpu.memory_space<vmem>>, vector<1x32xf32>
    %cst = arith.constant dense<0.000000e+00> : vector<8x32xf32>
    %4 = tpu.matmul %0, %1, %cst {dimension_numbers = #tpu.dot_dimension_numbers<[1], [0], [0], [1], [0, 0, 1, 1], [], []>} : vector<8x4xf32>, vector<4x32xf32>, vector<8x32xf32> -> vector<8x32xf32>
    %5 = vector.broadcast %3 : vector<1x32xf32> to vector<8x32xf32>
    %6 = arith.addf %4, %5 : vector<8x32xf32>
    %cst_7 = arith.constant 0.000000e+00 : f32
    %7 = vector.broadcast %cst_7 : f32 to vector<8x32xf32>
    %c0_i32 = arith.constant 0 : i32
    %cst_8 = arith.constant dense<0.000000e+00> : vector<8x32xf32>
    %8 = tpu.matmul %7, %2, %cst_8 {dimension_numbers = #tpu.dot_dimension_numbers<[1], [0], [0], [1], [0, 0, 1, 1], [], []>} : vector<8x32xf32>, vector<32x32xf32>, vector<8x32xf32> -> vector<8x32xf32>
    %9 = arith.addf %8, %6 : vector<8x32xf32>
    %10 = math.tanh %9 : vector<8x32xf32>
    %c1_i32 = arith.constant 1 : i32
    %cst_9 = arith.constant dense<0.000000e+00> : vector<8x32xf32>
    %11 = tpu.matmul %10, %2, %cst_9 {dimension_numbers = #tpu.dot_dimension_numbers<[1], [0], [0], [1], [0, 0, 1, 1], [], []>} : vector<8x32xf32>, vector<32x32xf32>, vector<8x32xf32> -> vector<8x32xf32>
    %12 = arith.addf %11, %6 : vector<8x32xf32>
    %13 = math.tanh %12 : vector<8x32xf32>
    %c2_i32 = arith.constant 2 : i32
    %cst_10 = arith.constant dense<0.000000e+00> : vector<8x32xf32>
    %14 = tpu.matmul %13, %2, %cst_10 {dimension_numbers = #tpu.dot_dimension_numbers<[1], [0], [0], [1], [0, 0, 1, 1], [], []>} : vector<8x32xf32>, vector<32x32xf32>, vector<8x32xf32> -> vector<8x32xf32>
    %15 = arith.addf %14, %6 : vector<8x32xf32>
    %16 = math.tanh %15 : vector<8x32xf32>
    %c3_i32 = arith.constant 3 : i32
    %cst_11 = arith.constant dense<0.000000e+00> : vector<8x32xf32>
    %17 = tpu.matmul %16, %2, %cst_11 {dimension_numbers = #tpu.dot_dimension_numbers<[1], [0], [0], [1], [0, 0, 1, 1], [], []>} : vector<8x32xf32>, vector<32x32xf32>, vector<8x32xf32> -> vector<8x32xf32>
    %18 = arith.addf %17, %6 : vector<8x32xf32>
    %19 = math.tanh %18 : vector<8x32xf32>
    %c4_i32 = arith.constant 4 : i32
    %cst_12 = arith.constant dense<0.000000e+00> : vector<8x32xf32>
    %20 = tpu.matmul %19, %2, %cst_12 {dimension_numbers = #tpu.dot_dimension_numbers<[1], [0], [0], [1], [0, 0, 1, 1], [], []>} : vector<8x32xf32>, vector<32x32xf32>, vector<8x32xf32> -> vector<8x32xf32>
    %21 = arith.addf %20, %6 : vector<8x32xf32>
    %22 = math.tanh %21 : vector<8x32xf32>
    %c5_i32 = arith.constant 5 : i32
    %cst_13 = arith.constant dense<0.000000e+00> : vector<8x32xf32>
    %23 = tpu.matmul %22, %2, %cst_13 {dimension_numbers = #tpu.dot_dimension_numbers<[1], [0], [0], [1], [0, 0, 1, 1], [], []>} : vector<8x32xf32>, vector<32x32xf32>, vector<8x32xf32> -> vector<8x32xf32>
    %24 = arith.addf %23, %6 : vector<8x32xf32>
    %25 = math.tanh %24 : vector<8x32xf32>
    %c6_i32 = arith.constant 6 : i32
    %cst_14 = arith.constant dense<0.000000e+00> : vector<8x32xf32>
    %26 = tpu.matmul %25, %2, %cst_14 {dimension_numbers = #tpu.dot_dimension_numbers<[1], [0], [0], [1], [0, 0, 1, 1], [], []>} : vector<8x32xf32>, vector<32x32xf32>, vector<8x32xf32> -> vector<8x32xf32>
    %27 = arith.addf %26, %6 : vector<8x32xf32>
    %28 = math.tanh %27 : vector<8x32xf32>
    %c7_i32 = arith.constant 7 : i32
    %cst_15 = arith.constant dense<0.000000e+00> : vector<8x32xf32>
    %29 = tpu.matmul %28, %2, %cst_15 {dimension_numbers = #tpu.dot_dimension_numbers<[1], [0], [0], [1], [0, 0, 1, 1], [], []>} : vector<8x32xf32>, vector<32x32xf32>, vector<8x32xf32> -> vector<8x32xf32>
    %30 = arith.addf %29, %6 : vector<8x32xf32>
    %31 = math.tanh %30 : vector<8x32xf32>
    %c8_i32 = arith.constant 8 : i32
    %cst_16 = arith.constant dense<0.000000e+00> : vector<8x32xf32>
    %32 = tpu.matmul %31, %2, %cst_16 {dimension_numbers = #tpu.dot_dimension_numbers<[1], [0], [0], [1], [0, 0, 1, 1], [], []>} : vector<8x32xf32>, vector<32x32xf32>, vector<8x32xf32> -> vector<8x32xf32>
    %33 = arith.addf %32, %6 : vector<8x32xf32>
    %34 = math.tanh %33 : vector<8x32xf32>
    %c9_i32 = arith.constant 9 : i32
    %cst_17 = arith.constant dense<0.000000e+00> : vector<8x32xf32>
    %35 = tpu.matmul %34, %2, %cst_17 {dimension_numbers = #tpu.dot_dimension_numbers<[1], [0], [0], [1], [0, 0, 1, 1], [], []>} : vector<8x32xf32>, vector<32x32xf32>, vector<8x32xf32> -> vector<8x32xf32>
    %36 = arith.addf %35, %6 : vector<8x32xf32>
    %37 = math.tanh %36 : vector<8x32xf32>
    %c10_i32 = arith.constant 10 : i32
    %cst_18 = arith.constant dense<0.000000e+00> : vector<8x32xf32>
    %38 = tpu.matmul %37, %2, %cst_18 {dimension_numbers = #tpu.dot_dimension_numbers<[1], [0], [0], [1], [0, 0, 1, 1], [], []>} : vector<8x32xf32>, vector<32x32xf32>, vector<8x32xf32> -> vector<8x32xf32>
    %39 = arith.addf %38, %6 : vector<8x32xf32>
    %40 = math.tanh %39 : vector<8x32xf32>
    %c11_i32 = arith.constant 11 : i32
    %cst_19 = arith.constant dense<0.000000e+00> : vector<8x32xf32>
    %41 = tpu.matmul %40, %2, %cst_19 {dimension_numbers = #tpu.dot_dimension_numbers<[1], [0], [0], [1], [0, 0, 1, 1], [], []>} : vector<8x32xf32>, vector<32x32xf32>, vector<8x32xf32> -> vector<8x32xf32>
    %42 = arith.addf %41, %6 : vector<8x32xf32>
    %43 = math.tanh %42 : vector<8x32xf32>
    %c12_i32 = arith.constant 12 : i32
    %cst_20 = arith.constant dense<0.000000e+00> : vector<8x32xf32>
    %44 = tpu.matmul %43, %2, %cst_20 {dimension_numbers = #tpu.dot_dimension_numbers<[1], [0], [0], [1], [0, 0, 1, 1], [], []>} : vector<8x32xf32>, vector<32x32xf32>, vector<8x32xf32> -> vector<8x32xf32>
    %45 = arith.addf %44, %6 : vector<8x32xf32>
    %46 = math.tanh %45 : vector<8x32xf32>
    %c13_i32 = arith.constant 13 : i32
    %cst_21 = arith.constant dense<0.000000e+00> : vector<8x32xf32>
    %47 = tpu.matmul %46, %2, %cst_21 {dimension_numbers = #tpu.dot_dimension_numbers<[1], [0], [0], [1], [0, 0, 1, 1], [], []>} : vector<8x32xf32>, vector<32x32xf32>, vector<8x32xf32> -> vector<8x32xf32>
    %48 = arith.addf %47, %6 : vector<8x32xf32>
    %49 = math.tanh %48 : vector<8x32xf32>
    %c14_i32 = arith.constant 14 : i32
    %cst_22 = arith.constant dense<0.000000e+00> : vector<8x32xf32>
    %50 = tpu.matmul %49, %2, %cst_22 {dimension_numbers = #tpu.dot_dimension_numbers<[1], [0], [0], [1], [0, 0, 1, 1], [], []>} : vector<8x32xf32>, vector<32x32xf32>, vector<8x32xf32> -> vector<8x32xf32>
    %51 = arith.addf %50, %6 : vector<8x32xf32>
    %52 = math.tanh %51 : vector<8x32xf32>
    %c15_i32 = arith.constant 15 : i32
    %cst_23 = arith.constant dense<0.000000e+00> : vector<8x32xf32>
    %53 = tpu.matmul %52, %2, %cst_23 {dimension_numbers = #tpu.dot_dimension_numbers<[1], [0], [0], [1], [0, 0, 1, 1], [], []>} : vector<8x32xf32>, vector<32x32xf32>, vector<8x32xf32> -> vector<8x32xf32>
    %54 = arith.addf %53, %6 : vector<8x32xf32>
    %55 = math.tanh %54 : vector<8x32xf32>
    %c16_i32 = arith.constant 16 : i32
    %cst_24 = arith.constant dense<0.000000e+00> : vector<8x32xf32>
    %56 = tpu.matmul %55, %2, %cst_24 {dimension_numbers = #tpu.dot_dimension_numbers<[1], [0], [0], [1], [0, 0, 1, 1], [], []>} : vector<8x32xf32>, vector<32x32xf32>, vector<8x32xf32> -> vector<8x32xf32>
    %57 = arith.addf %56, %6 : vector<8x32xf32>
    %58 = math.tanh %57 : vector<8x32xf32>
    %c17_i32 = arith.constant 17 : i32
    %cst_25 = arith.constant dense<0.000000e+00> : vector<8x32xf32>
    %59 = tpu.matmul %58, %2, %cst_25 {dimension_numbers = #tpu.dot_dimension_numbers<[1], [0], [0], [1], [0, 0, 1, 1], [], []>} : vector<8x32xf32>, vector<32x32xf32>, vector<8x32xf32> -> vector<8x32xf32>
    %60 = arith.addf %59, %6 : vector<8x32xf32>
    %61 = math.tanh %60 : vector<8x32xf32>
    %c18_i32 = arith.constant 18 : i32
    %cst_26 = arith.constant dense<0.000000e+00> : vector<8x32xf32>
    %62 = tpu.matmul %61, %2, %cst_26 {dimension_numbers = #tpu.dot_dimension_numbers<[1], [0], [0], [1], [0, 0, 1, 1], [], []>} : vector<8x32xf32>, vector<32x32xf32>, vector<8x32xf32> -> vector<8x32xf32>
    %63 = arith.addf %62, %6 : vector<8x32xf32>
    %64 = math.tanh %63 : vector<8x32xf32>
    %c19_i32 = arith.constant 19 : i32
    %cst_27 = arith.constant dense<0.000000e+00> : vector<8x32xf32>
    %65 = tpu.matmul %64, %2, %cst_27 {dimension_numbers = #tpu.dot_dimension_numbers<[1], [0], [0], [1], [0, 0, 1, 1], [], []>} : vector<8x32xf32>, vector<32x32xf32>, vector<8x32xf32> -> vector<8x32xf32>
    %66 = arith.addf %65, %6 : vector<8x32xf32>
    %67 = math.tanh %66 : vector<8x32xf32>
    %c20_i32 = arith.constant 20 : i32
    %cst_28 = arith.constant dense<0.000000e+00> : vector<8x32xf32>
    %68 = tpu.matmul %67, %2, %cst_28 {dimension_numbers = #tpu.dot_dimension_numbers<[1], [0], [0], [1], [0, 0, 1, 1], [], []>} : vector<8x32xf32>, vector<32x32xf32>, vector<8x32xf32> -> vector<8x32xf32>
    %69 = arith.addf %68, %6 : vector<8x32xf32>
    %70 = math.tanh %69 : vector<8x32xf32>
    %c21_i32 = arith.constant 21 : i32
    %cst_29 = arith.constant dense<0.000000e+00> : vector<8x32xf32>
    %71 = tpu.matmul %70, %2, %cst_29 {dimension_numbers = #tpu.dot_dimension_numbers<[1], [0], [0], [1], [0, 0, 1, 1], [], []>} : vector<8x32xf32>, vector<32x32xf32>, vector<8x32xf32> -> vector<8x32xf32>
    %72 = arith.addf %71, %6 : vector<8x32xf32>
    %73 = math.tanh %72 : vector<8x32xf32>
    %c22_i32 = arith.constant 22 : i32
    %cst_30 = arith.constant dense<0.000000e+00> : vector<8x32xf32>
    %74 = tpu.matmul %73, %2, %cst_30 {dimension_numbers = #tpu.dot_dimension_numbers<[1], [0], [0], [1], [0, 0, 1, 1], [], []>} : vector<8x32xf32>, vector<32x32xf32>, vector<8x32xf32> -> vector<8x32xf32>
    %75 = arith.addf %74, %6 : vector<8x32xf32>
    %76 = math.tanh %75 : vector<8x32xf32>
    %c23_i32 = arith.constant 23 : i32
    %cst_31 = arith.constant dense<0.000000e+00> : vector<8x32xf32>
    %77 = tpu.matmul %76, %2, %cst_31 {dimension_numbers = #tpu.dot_dimension_numbers<[1], [0], [0], [1], [0, 0, 1, 1], [], []>} : vector<8x32xf32>, vector<32x32xf32>, vector<8x32xf32> -> vector<8x32xf32>
    %78 = arith.addf %77, %6 : vector<8x32xf32>
    %79 = math.tanh %78 : vector<8x32xf32>
    %c24_i32 = arith.constant 24 : i32
    %cst_32 = arith.constant dense<0.000000e+00> : vector<8x32xf32>
    %80 = tpu.matmul %79, %2, %cst_32 {dimension_numbers = #tpu.dot_dimension_numbers<[1], [0], [0], [1], [0, 0, 1, 1], [], []>} : vector<8x32xf32>, vector<32x32xf32>, vector<8x32xf32> -> vector<8x32xf32>
    %81 = arith.addf %80, %6 : vector<8x32xf32>
    %82 = math.tanh %81 : vector<8x32xf32>
    %c25_i32 = arith.constant 25 : i32
    %cst_33 = arith.constant dense<0.000000e+00> : vector<8x32xf32>
    %83 = tpu.matmul %82, %2, %cst_33 {dimension_numbers = #tpu.dot_dimension_numbers<[1], [0], [0], [1], [0, 0, 1, 1], [], []>} : vector<8x32xf32>, vector<32x32xf32>, vector<8x32xf32> -> vector<8x32xf32>
    %84 = arith.addf %83, %6 : vector<8x32xf32>
    %85 = math.tanh %84 : vector<8x32xf32>
    %c26_i32 = arith.constant 26 : i32
    %cst_34 = arith.constant dense<0.000000e+00> : vector<8x32xf32>
    %86 = tpu.matmul %85, %2, %cst_34 {dimension_numbers = #tpu.dot_dimension_numbers<[1], [0], [0], [1], [0, 0, 1, 1], [], []>} : vector<8x32xf32>, vector<32x32xf32>, vector<8x32xf32> -> vector<8x32xf32>
    %87 = arith.addf %86, %6 : vector<8x32xf32>
    %88 = math.tanh %87 : vector<8x32xf32>
    %c27_i32 = arith.constant 27 : i32
    %cst_35 = arith.constant dense<0.000000e+00> : vector<8x32xf32>
    %89 = tpu.matmul %88, %2, %cst_35 {dimension_numbers = #tpu.dot_dimension_numbers<[1], [0], [0], [1], [0, 0, 1, 1], [], []>} : vector<8x32xf32>, vector<32x32xf32>, vector<8x32xf32> -> vector<8x32xf32>
    %90 = arith.addf %89, %6 : vector<8x32xf32>
    %91 = math.tanh %90 : vector<8x32xf32>
    %c28_i32 = arith.constant 28 : i32
    %cst_36 = arith.constant dense<0.000000e+00> : vector<8x32xf32>
    %92 = tpu.matmul %91, %2, %cst_36 {dimension_numbers = #tpu.dot_dimension_numbers<[1], [0], [0], [1], [0, 0, 1, 1], [], []>} : vector<8x32xf32>, vector<32x32xf32>, vector<8x32xf32> -> vector<8x32xf32>
    %93 = arith.addf %92, %6 : vector<8x32xf32>
    %94 = math.tanh %93 : vector<8x32xf32>
    %c29_i32 = arith.constant 29 : i32
    %cst_37 = arith.constant dense<0.000000e+00> : vector<8x32xf32>
    %95 = tpu.matmul %94, %2, %cst_37 {dimension_numbers = #tpu.dot_dimension_numbers<[1], [0], [0], [1], [0, 0, 1, 1], [], []>} : vector<8x32xf32>, vector<32x32xf32>, vector<8x32xf32> -> vector<8x32xf32>
    %96 = arith.addf %95, %6 : vector<8x32xf32>
    %97 = math.tanh %96 : vector<8x32xf32>
    %c30_i32 = arith.constant 30 : i32
    %cst_38 = arith.constant dense<0.000000e+00> : vector<8x32xf32>
    %98 = tpu.matmul %97, %2, %cst_38 {dimension_numbers = #tpu.dot_dimension_numbers<[1], [0], [0], [1], [0, 0, 1, 1], [], []>} : vector<8x32xf32>, vector<32x32xf32>, vector<8x32xf32> -> vector<8x32xf32>
    %99 = arith.addf %98, %6 : vector<8x32xf32>
    %100 = math.tanh %99 : vector<8x32xf32>
    %c31_i32 = arith.constant 31 : i32
    %cst_39 = arith.constant dense<0.000000e+00> : vector<8x32xf32>
    %101 = tpu.matmul %100, %2, %cst_39 {dimension_numbers = #tpu.dot_dimension_numbers<[1], [0], [0], [1], [0, 0, 1, 1], [], []>} : vector<8x32xf32>, vector<32x32xf32>, vector<8x32xf32> -> vector<8x32xf32>
    %102 = arith.addf %101, %6 : vector<8x32xf32>
    %103 = math.tanh %102 : vector<8x32xf32>
    %c32_i32 = arith.constant 32 : i32
    %cst_40 = arith.constant dense<0.000000e+00> : vector<8x32xf32>
    %104 = tpu.matmul %103, %2, %cst_40 {dimension_numbers = #tpu.dot_dimension_numbers<[1], [0], [0], [1], [0, 0, 1, 1], [], []>} : vector<8x32xf32>, vector<32x32xf32>, vector<8x32xf32> -> vector<8x32xf32>
    %105 = arith.addf %104, %6 : vector<8x32xf32>
    %106 = math.tanh %105 : vector<8x32xf32>
    %c33_i32 = arith.constant 33 : i32
    %cst_41 = arith.constant dense<0.000000e+00> : vector<8x32xf32>
    %107 = tpu.matmul %106, %2, %cst_41 {dimension_numbers = #tpu.dot_dimension_numbers<[1], [0], [0], [1], [0, 0, 1, 1], [], []>} : vector<8x32xf32>, vector<32x32xf32>, vector<8x32xf32> -> vector<8x32xf32>
    %108 = arith.addf %107, %6 : vector<8x32xf32>
    %109 = math.tanh %108 : vector<8x32xf32>
    %c34_i32 = arith.constant 34 : i32
    %cst_42 = arith.constant dense<0.000000e+00> : vector<8x32xf32>
    %110 = tpu.matmul %109, %2, %cst_42 {dimension_numbers = #tpu.dot_dimension_numbers<[1], [0], [0], [1], [0, 0, 1, 1], [], []>} : vector<8x32xf32>, vector<32x32xf32>, vector<8x32xf32> -> vector<8x32xf32>
    %111 = arith.addf %110, %6 : vector<8x32xf32>
    %112 = math.tanh %111 : vector<8x32xf32>
    %c35_i32 = arith.constant 35 : i32
    %cst_43 = arith.constant dense<0.000000e+00> : vector<8x32xf32>
    %113 = tpu.matmul %112, %2, %cst_43 {dimension_numbers = #tpu.dot_dimension_numbers<[1], [0], [0], [1], [0, 0, 1, 1], [], []>} : vector<8x32xf32>, vector<32x32xf32>, vector<8x32xf32> -> vector<8x32xf32>
    %114 = arith.addf %113, %6 : vector<8x32xf32>
    %115 = math.tanh %114 : vector<8x32xf32>
    %c36_i32 = arith.constant 36 : i32
    %cst_44 = arith.constant dense<0.000000e+00> : vector<8x32xf32>
    %116 = tpu.matmul %115, %2, %cst_44 {dimension_numbers = #tpu.dot_dimension_numbers<[1], [0], [0], [1], [0, 0, 1, 1], [], []>} : vector<8x32xf32>, vector<32x32xf32>, vector<8x32xf32> -> vector<8x32xf32>
    %117 = arith.addf %116, %6 : vector<8x32xf32>
    %118 = math.tanh %117 : vector<8x32xf32>
    %c37_i32 = arith.constant 37 : i32
    %cst_45 = arith.constant dense<0.000000e+00> : vector<8x32xf32>
    %119 = tpu.matmul %118, %2, %cst_45 {dimension_numbers = #tpu.dot_dimension_numbers<[1], [0], [0], [1], [0, 0, 1, 1], [], []>} : vector<8x32xf32>, vector<32x32xf32>, vector<8x32xf32> -> vector<8x32xf32>
    %120 = arith.addf %119, %6 : vector<8x32xf32>
    %121 = math.tanh %120 : vector<8x32xf32>
    %c38_i32 = arith.constant 38 : i32
    %cst_46 = arith.constant dense<0.000000e+00> : vector<8x32xf32>
    %122 = tpu.matmul %121, %2, %cst_46 {dimension_numbers = #tpu.dot_dimension_numbers<[1], [0], [0], [1], [0, 0, 1, 1], [], []>} : vector<8x32xf32>, vector<32x32xf32>, vector<8x32xf32> -> vector<8x32xf32>
    %123 = arith.addf %122, %6 : vector<8x32xf32>
    %124 = math.tanh %123 : vector<8x32xf32>
    %c39_i32 = arith.constant 39 : i32
    %cst_47 = arith.constant dense<0.000000e+00> : vector<8x32xf32>
    %125 = tpu.matmul %124, %2, %cst_47 {dimension_numbers = #tpu.dot_dimension_numbers<[1], [0], [0], [1], [0, 0, 1, 1], [], []>} : vector<8x32xf32>, vector<32x32xf32>, vector<8x32xf32> -> vector<8x32xf32>
    %126 = arith.addf %125, %6 : vector<8x32xf32>
    %127 = math.tanh %126 : vector<8x32xf32>
    %c40_i32 = arith.constant 40 : i32
    %cst_48 = arith.constant dense<0.000000e+00> : vector<8x32xf32>
    %128 = tpu.matmul %127, %2, %cst_48 {dimension_numbers = #tpu.dot_dimension_numbers<[1], [0], [0], [1], [0, 0, 1, 1], [], []>} : vector<8x32xf32>, vector<32x32xf32>, vector<8x32xf32> -> vector<8x32xf32>
    %129 = arith.addf %128, %6 : vector<8x32xf32>
    %130 = math.tanh %129 : vector<8x32xf32>
    %c41_i32 = arith.constant 41 : i32
    %cst_49 = arith.constant dense<0.000000e+00> : vector<8x32xf32>
    %131 = tpu.matmul %130, %2, %cst_49 {dimension_numbers = #tpu.dot_dimension_numbers<[1], [0], [0], [1], [0, 0, 1, 1], [], []>} : vector<8x32xf32>, vector<32x32xf32>, vector<8x32xf32> -> vector<8x32xf32>
    %132 = arith.addf %131, %6 : vector<8x32xf32>
    %133 = math.tanh %132 : vector<8x32xf32>
    %c42_i32 = arith.constant 42 : i32
    %cst_50 = arith.constant dense<0.000000e+00> : vector<8x32xf32>
    %134 = tpu.matmul %133, %2, %cst_50 {dimension_numbers = #tpu.dot_dimension_numbers<[1], [0], [0], [1], [0, 0, 1, 1], [], []>} : vector<8x32xf32>, vector<32x32xf32>, vector<8x32xf32> -> vector<8x32xf32>
    %135 = arith.addf %134, %6 : vector<8x32xf32>
    %136 = math.tanh %135 : vector<8x32xf32>
    %c43_i32 = arith.constant 43 : i32
    %cst_51 = arith.constant dense<0.000000e+00> : vector<8x32xf32>
    %137 = tpu.matmul %136, %2, %cst_51 {dimension_numbers = #tpu.dot_dimension_numbers<[1], [0], [0], [1], [0, 0, 1, 1], [], []>} : vector<8x32xf32>, vector<32x32xf32>, vector<8x32xf32> -> vector<8x32xf32>
    %138 = arith.addf %137, %6 : vector<8x32xf32>
    %139 = math.tanh %138 : vector<8x32xf32>
    %c44_i32 = arith.constant 44 : i32
    %cst_52 = arith.constant dense<0.000000e+00> : vector<8x32xf32>
    %140 = tpu.matmul %139, %2, %cst_52 {dimension_numbers = #tpu.dot_dimension_numbers<[1], [0], [0], [1], [0, 0, 1, 1], [], []>} : vector<8x32xf32>, vector<32x32xf32>, vector<8x32xf32> -> vector<8x32xf32>
    %141 = arith.addf %140, %6 : vector<8x32xf32>
    %142 = math.tanh %141 : vector<8x32xf32>
    %c45_i32 = arith.constant 45 : i32
    %cst_53 = arith.constant dense<0.000000e+00> : vector<8x32xf32>
    %143 = tpu.matmul %142, %2, %cst_53 {dimension_numbers = #tpu.dot_dimension_numbers<[1], [0], [0], [1], [0, 0, 1, 1], [], []>} : vector<8x32xf32>, vector<32x32xf32>, vector<8x32xf32> -> vector<8x32xf32>
    %144 = arith.addf %143, %6 : vector<8x32xf32>
    %145 = math.tanh %144 : vector<8x32xf32>
    %c46_i32 = arith.constant 46 : i32
    %cst_54 = arith.constant dense<0.000000e+00> : vector<8x32xf32>
    %146 = tpu.matmul %145, %2, %cst_54 {dimension_numbers = #tpu.dot_dimension_numbers<[1], [0], [0], [1], [0, 0, 1, 1], [], []>} : vector<8x32xf32>, vector<32x32xf32>, vector<8x32xf32> -> vector<8x32xf32>
    %147 = arith.addf %146, %6 : vector<8x32xf32>
    %148 = math.tanh %147 : vector<8x32xf32>
    %c47_i32 = arith.constant 47 : i32
    %cst_55 = arith.constant dense<0.000000e+00> : vector<8x32xf32>
    %149 = tpu.matmul %148, %2, %cst_55 {dimension_numbers = #tpu.dot_dimension_numbers<[1], [0], [0], [1], [0, 0, 1, 1], [], []>} : vector<8x32xf32>, vector<32x32xf32>, vector<8x32xf32> -> vector<8x32xf32>
    %150 = arith.addf %149, %6 : vector<8x32xf32>
    %151 = math.tanh %150 : vector<8x32xf32>
    %c48_i32 = arith.constant 48 : i32
    %cst_56 = arith.constant dense<0.000000e+00> : vector<8x32xf32>
    %152 = tpu.matmul %151, %2, %cst_56 {dimension_numbers = #tpu.dot_dimension_numbers<[1], [0], [0], [1], [0, 0, 1, 1], [], []>} : vector<8x32xf32>, vector<32x32xf32>, vector<8x32xf32> -> vector<8x32xf32>
    %153 = arith.addf %152, %6 : vector<8x32xf32>
    %154 = math.tanh %153 : vector<8x32xf32>
    %c49_i32 = arith.constant 49 : i32
    %cst_57 = arith.constant dense<0.000000e+00> : vector<8x32xf32>
    %155 = tpu.matmul %154, %2, %cst_57 {dimension_numbers = #tpu.dot_dimension_numbers<[1], [0], [0], [1], [0, 0, 1, 1], [], []>} : vector<8x32xf32>, vector<32x32xf32>, vector<8x32xf32> -> vector<8x32xf32>
    %156 = arith.addf %155, %6 : vector<8x32xf32>
    %157 = math.tanh %156 : vector<8x32xf32>
    %c50_i32 = arith.constant 50 : i32
    %cst_58 = arith.constant dense<0.000000e+00> : vector<8x32xf32>
    %158 = tpu.matmul %157, %2, %cst_58 {dimension_numbers = #tpu.dot_dimension_numbers<[1], [0], [0], [1], [0, 0, 1, 1], [], []>} : vector<8x32xf32>, vector<32x32xf32>, vector<8x32xf32> -> vector<8x32xf32>
    %159 = arith.addf %158, %6 : vector<8x32xf32>
    %160 = math.tanh %159 : vector<8x32xf32>
    %c51_i32 = arith.constant 51 : i32
    %cst_59 = arith.constant dense<0.000000e+00> : vector<8x32xf32>
    %161 = tpu.matmul %160, %2, %cst_59 {dimension_numbers = #tpu.dot_dimension_numbers<[1], [0], [0], [1], [0, 0, 1, 1], [], []>} : vector<8x32xf32>, vector<32x32xf32>, vector<8x32xf32> -> vector<8x32xf32>
    %162 = arith.addf %161, %6 : vector<8x32xf32>
    %163 = math.tanh %162 : vector<8x32xf32>
    %c52_i32 = arith.constant 52 : i32
    %cst_60 = arith.constant dense<0.000000e+00> : vector<8x32xf32>
    %164 = tpu.matmul %163, %2, %cst_60 {dimension_numbers = #tpu.dot_dimension_numbers<[1], [0], [0], [1], [0, 0, 1, 1], [], []>} : vector<8x32xf32>, vector<32x32xf32>, vector<8x32xf32> -> vector<8x32xf32>
    %165 = arith.addf %164, %6 : vector<8x32xf32>
    %166 = math.tanh %165 : vector<8x32xf32>
    %c53_i32 = arith.constant 53 : i32
    %cst_61 = arith.constant dense<0.000000e+00> : vector<8x32xf32>
    %167 = tpu.matmul %166, %2, %cst_61 {dimension_numbers = #tpu.dot_dimension_numbers<[1], [0], [0], [1], [0, 0, 1, 1], [], []>} : vector<8x32xf32>, vector<32x32xf32>, vector<8x32xf32> -> vector<8x32xf32>
    %168 = arith.addf %167, %6 : vector<8x32xf32>
    %169 = math.tanh %168 : vector<8x32xf32>
    %c54_i32 = arith.constant 54 : i32
    %cst_62 = arith.constant dense<0.000000e+00> : vector<8x32xf32>
    %170 = tpu.matmul %169, %2, %cst_62 {dimension_numbers = #tpu.dot_dimension_numbers<[1], [0], [0], [1], [0, 0, 1, 1], [], []>} : vector<8x32xf32>, vector<32x32xf32>, vector<8x32xf32> -> vector<8x32xf32>
    %171 = arith.addf %170, %6 : vector<8x32xf32>
    %172 = math.tanh %171 : vector<8x32xf32>
    %c55_i32 = arith.constant 55 : i32
    %cst_63 = arith.constant dense<0.000000e+00> : vector<8x32xf32>
    %173 = tpu.matmul %172, %2, %cst_63 {dimension_numbers = #tpu.dot_dimension_numbers<[1], [0], [0], [1], [0, 0, 1, 1], [], []>} : vector<8x32xf32>, vector<32x32xf32>, vector<8x32xf32> -> vector<8x32xf32>
    %174 = arith.addf %173, %6 : vector<8x32xf32>
    %175 = math.tanh %174 : vector<8x32xf32>
    %c56_i32 = arith.constant 56 : i32
    %cst_64 = arith.constant dense<0.000000e+00> : vector<8x32xf32>
    %176 = tpu.matmul %175, %2, %cst_64 {dimension_numbers = #tpu.dot_dimension_numbers<[1], [0], [0], [1], [0, 0, 1, 1], [], []>} : vector<8x32xf32>, vector<32x32xf32>, vector<8x32xf32> -> vector<8x32xf32>
    %177 = arith.addf %176, %6 : vector<8x32xf32>
    %178 = math.tanh %177 : vector<8x32xf32>
    %c57_i32 = arith.constant 57 : i32
    %cst_65 = arith.constant dense<0.000000e+00> : vector<8x32xf32>
    %179 = tpu.matmul %178, %2, %cst_65 {dimension_numbers = #tpu.dot_dimension_numbers<[1], [0], [0], [1], [0, 0, 1, 1], [], []>} : vector<8x32xf32>, vector<32x32xf32>, vector<8x32xf32> -> vector<8x32xf32>
    %180 = arith.addf %179, %6 : vector<8x32xf32>
    %181 = math.tanh %180 : vector<8x32xf32>
    %c58_i32 = arith.constant 58 : i32
    %cst_66 = arith.constant dense<0.000000e+00> : vector<8x32xf32>
    %182 = tpu.matmul %181, %2, %cst_66 {dimension_numbers = #tpu.dot_dimension_numbers<[1], [0], [0], [1], [0, 0, 1, 1], [], []>} : vector<8x32xf32>, vector<32x32xf32>, vector<8x32xf32> -> vector<8x32xf32>
    %183 = arith.addf %182, %6 : vector<8x32xf32>
    %184 = math.tanh %183 : vector<8x32xf32>
    %cst_67 = arith.constant dense<0.000000e+00> : vector<8x32xf32>
    %185 = tpu.matmul %184, %2, %cst_67 {dimension_numbers = #tpu.dot_dimension_numbers<[1], [0], [0], [1], [0, 0, 1, 1], [], []>} : vector<8x32xf32>, vector<32x32xf32>, vector<8x32xf32> -> vector<8x32xf32>
    %186 = arith.addf %185, %6 : vector<8x32xf32>
    %187 = math.tanh %186 : vector<8x32xf32>
    %188 = arith.subf %187, %184 : vector<8x32xf32>
    %189 = arith.mulf %188, %188 : vector<8x32xf32>
    %190 = vector.shape_cast %189 : vector<8x32xf32> to vector<1x8x32xf32>
    %cst_68 = arith.constant dense<0.000000e+00> : vector<1xf32>
    %191 = vector.multi_reduction <add>, %190, %cst_68 [1, 2] : vector<1x8x32xf32> to vector<1xf32>
    %192 = vector.shape_cast %191 : vector<1xf32> to vector<1x1x1xf32>
    %193 = vector.extract %192[0, 0, 0] : f32 from vector<1x1x1xf32>
    %194 = math.sqrt %193 : f32
    %195 = arith.mulf %187, %187 : vector<8x32xf32>
    %196 = vector.shape_cast %195 : vector<8x32xf32> to vector<1x8x32xf32>
    %cst_69 = arith.constant dense<0.000000e+00> : vector<1xf32>
    %197 = vector.multi_reduction <add>, %196, %cst_69 [1, 2] : vector<1x8x32xf32> to vector<1xf32>
    %198 = vector.shape_cast %197 : vector<1xf32> to vector<1x1x1xf32>
    %199 = vector.extract %198[0, 0, 0] : f32 from vector<1x1x1xf32>
    %200 = math.sqrt %199 : f32
    %cst_70 = arith.constant 9.99999993E-9 : f32
    %201 = arith.addf %200, %cst_70 : f32
    %202 = arith.divf %194, %201 : f32
    %c0_71 = arith.constant 0 : index
    %c0_72 = arith.constant 0 : index
    %203 = vector.load %arg4[%c0_71, %c0_72] : memref<8x32xf32, #tpu.memory_space<vmem>>, vector<8x32xf32>
    tpu.vector_store %arg4[%c0_71, %c0_72], %187 {strides = array<i32>} : memref<8x32xf32, #tpu.memory_space<vmem>>, vector<8x32xf32>,
    %c0_73 = arith.constant 0 : index
    %c0_74 = arith.constant 0 : index
    %204 = memref.load %arg5[%c0_73, %c0_74] : memref<1x1xf32, #tpu.memory_space<smem>>
    memref.store %202, %arg5[%c0_73, %c0_74] : memref<1x1xf32, #tpu.memory_space<smem>>
    return
  }
}

</mosaic_0001>

<bundles_post_ra>
// kernel: tpu_custom_call.1
= control target key start
LH: loop header
LB: loop body
LE: loop exit
PB: predicated region body
PF: predicated region fallthrough
CT: control target
= control target key end

     0   :  { %11 = vsyncpa [#allocation3], 0  ;;  %s6815_s0 = inlined_call_operand.vmem [shape: f32[8,4], index: 0, kind: input, shape index: {}]   ;;  %s6816_s1 = inlined_call_operand.vmem [shape: f32[4,32], index: 1, kind: input, shape index: {}]   ;;  %s6817_s2 = inlined_call_operand.hbm [shape: f32[32,32], index: 2, kind: input, shape index: {}]   ;;  %s6818_s3 = inlined_call_operand.vmem [shape: f32[1,32], index: 3, kind: input, shape index: {}]   ;;  %s6819_s4 = inlined_call_operand.hbm [shape: f32[8,32], index: 4, kind: output, shape index: {0}]   ;;  %s6820_s5 = inlined_call_operand.hbm [shape: f32[1,1], index: 5, kind: output, shape index: {1}]  }
   0x1   :  { %12 = vsyncpa [#allocation4], 0 }
   0x2   :  { %13 = vsyncpa [#allocation5], 0  ;;  %s6237_s18 = smov [#allocation2]   ;;  %s6177_s22 = scalar_lea.hbm %s6817_s2, 512 }
   0x3   :  { %s23_s19 = sshll.u32 %s6237_s18, 4  ;;  %p6178_p0 = scmp.ne.s32.totalorder %s6817_s2, %s6177_s22  ;;  %s24_s19 = int_to_ptr.vmem [resolvable:$true] %s23_s19 }
   0x4   :  { %p6181_p1 = scmp.lt.u32.totalorder %s6177_s22, %s6817_s2 }
   0x6   :  { %p6183_p2 = pnand %p6181_p1, %p6178_p0 }
   0x8   :  { %6186 = shalt.err (!%p6183_p2)
}
   0x9   :  { %s6187_s27 = scalar_lea.vmem %s24_s19, 512  ;;  %p6192_p4 = scmp.lt.s32.totalorder %s24_s19, %s24_s19 }
   0xa   :  { %p6188_p3 = scmp.ne.s32.totalorder %s24_s19, %s6187_s27  ;;  %p6193_p5 = scmp.lt.s32.totalorder %s6187_s27, %s6187_s27 }
   0xc   :  { %p6194_p6 = por %p6193_p5, %p6192_p4 }
   0xe   :  { %p6195_p7 = pnand %p6194_p6, %p6188_p3 }
  0x10   :  { %6198 = shalt.err (!%p6195_p7)
}
  0x11   :  { %s6238_s28 = smov 128   ;;  %s6239_s29 = smov 8  }
  0x12   :  { %29 = dma.hbm_to_vmem [thread:$0]  %s6817_s2, 512, %s24_s19, [#allocation3], %s6238_s28, %s6238_s28, %s6239_s29  }
  0x13   :  { %6231 = dma.done.wait [#allocation3], 512  }
  0x14   :  { %6232 = vsyncadd [#allocation3], 4294966784  ;;  %v6240_v0 = vmov 0.0|0.0   ;;  %v6241_v1 = vmov 0.0   ;;  %vm6242_vm0 = vmmov 0   ;;  %vm52_vm1 = vcmask 1043456  }
  0x15   :  { %5673 = vmatprep.subr.bf16.mxu1 %v6240_v0  ;;  %5008 = vmatprep.subr.mxu0 %v6241_v1  ;;  %v37_v2 = vld [vmem:[#allocation2] sm:$0xff]  ;;  %v38_v3 = vld [vmem:[#allocation2 + $0x8] sm:$0xff]  ;;  %v39_v4 = vld [vmem:[#allocation2 + $0x10] sm:$0xff]  ;;  %vm48_vm2 = vcmask 31744   ;;  %vm126_vm3 = vcmask 261120   ;;  %s6243_s12 = smov [#allocation6]  }
  0x16   :  { %5010 = vmatprep.mubr.msk.f32.mxu0 %vm6242_vm0, %v6241_v1  ;;  %5021 = vmatprep.mubr.msk.f32.mxu1 %vm6242_vm0, %v6241_v1  ;;  %v40_v5 = vld [vmem:[#allocation2 + $0x18] sm:$0xff]  ;;  %v6293_v6 = vpack.c.bf16 %v38_v3, %v37_v2  ;;  %s4622_s13 = sshll.u32 %s6243_s12, 4  ;;  %s4623_s13 = int_to_ptr.vmem [resolvable:$true] %s4622_s13 }
  0x17   :  { %v36_v7 = vld [vmem:[%s6816_s1] sm:$0xf]  ;;  %v6301_v9 = vpack.c.bf16 %v40_v5, %v39_v4  ;;  %s6199_s14 = scalar_lea.vmem %s4623_s13, 128  ;;  %p6204_p9 = scmp.lt.s32.totalorder %s4623_s13, %s4623_s13 }
  0x18   :  { %5009 = vmatpush3.msk.msra.mxu0 %vm52_vm1, %v36_v7  ;;  %v35_v8 = vld [vmem:[%s6815_s0] sm:$0xff]  ;;  %5675 = vmatpush3.bf16.msra.mxu1 %v6293_v6  ;;  %p6200_p8 = scmp.ne.s32.totalorder %s4623_s13, %s6199_s14  ;;  %p6205_p10 = scmp.lt.s32.totalorder %s6199_s14, %s6199_s14 }
  0x19   :  { %5011 = vmatmul.mubr.msk.f32.vlgmr.msra.gmra.mrb[0].mxu0 %vm48_vm2, %v35_v8  ;;  %5676 = vmatprep.subr.bf16.mxu1 %v6240_v0  ;;  %v4644_v11 = vld [vmem:[%s6818_s3] ss:$0 sm:$0xff] }
  0x1a   :  { %5679 = vmatprep.subr.bf16.mxu0 %v6240_v0  ;;  %5032 = vmatprep.mubr.msk.f32.mxu0 %vm6242_vm0, %v6241_v1  ;;  %p6206_p11 = por %p6205_p10, %p6204_p9 }
  0x1b   :  { %5681 = vmatpush3.bf16.msra.mxu0 %v6293_v6 }
  0x1c   :  { %5682 = vmatprep.subr.bf16.mxu0 %v6240_v0  ;;  %5678 = vmatpush3.bf16.msra.mxu1 %v6301_v9  ;;  %p6207_p12 = pnand %p6206_p11, %p6200_p8 }
  0x1d   :  { %5685 = vmatprep.subr.bf16.mxu1 %v6240_v0 }
  0x1f   :  { %5684 = vmatpush3.bf16.msra.mxu0 %v6301_v9  ;;  %5022 = vmatmul.mubr.f32.vlgmr.msra.gmra.mrb[0].mxu1 %v6241_v1 }
  0x20   :  { %5691 = vmatprep.subr.bf16.mxu0 %v6240_v0  ;;  %5687 = vmatpush3.bf16.msra.mxu1 %v6293_v6 }
  0x21   :  { %5043 = vmatprep.mubr.msk.f32.mxu1 %vm6242_vm0, %v6241_v1  ;;  %5688 = vmatprep.subr.bf16.mxu1 %v6240_v0 }
  0x24   :  { %5690 = vmatpush3.bf16.msra.mxu1 %v6301_v9 }
  0x25   :  { %5697 = vmatprep.subr.bf16.mxu1 %v6240_v0 }
  0xec   :  { %v122_v10 = vpop.f32.mrb[0].mxu0 }
  0xed   :  { %v5012_v12 = vpop.f32.mrb[1].mxu0  ;;  %v6324_v13 = vadd.f32 %v4644_v11, %v122_v10 }
  0xf2   :  { %v196_v14 = vpop.f32.mrb[0].mxu1 }
  0xf3   :  { %v197_v15 = vadd.f32 %v196_v14, %v6324_v13  ;;  %v5023_v16 = vpop.f32.mrb[1].mxu1 }
  0xf5   :  { %6051 = vtanh.f32 %v197_v15 }
  0xff   :  { %v6052_v17 = vpop.eup %6051 }
 0x100   :  { %5033 = vmatmul.mubr.msk.f32.vlgmr.msra.gmra.mrb[2].mxu0 %vm126_vm3, %v6052_v17 }
 0x101   :  { %5693 = vmatpush3.bf16.msra.mxu0 %v6293_v6  ;;  %5054 = vmatprep.mubr.msk.f32.mxu0 %vm6242_vm0, %v6241_v1 }
 0x102   :  { %5694 = vmatprep.subr.bf16.mxu0 %v6240_v0 }
 0x105   :  { %5696 = vmatpush3.bf16.msra.mxu0 %v6301_v9 }
 0x106   :  { %5703 = vmatprep.subr.bf16.mxu0 %v6240_v0 }
 0x1d3   :  { %v270_v18 = vpop.f32.mrb[2].mxu0 }
 0x1d4   :  { %v271_v19 = vadd.f32 %v270_v18, %v6324_v13  ;;  %v5034_v20 = vpop.f32.mrb[3].mxu0 }
 0x1d6   :  { %6053 = vtanh.f32 %v271_v19 }
 0x1e0   :  { %v6054_v21 = vpop.eup %6053 }
 0x1e1   :  { %5044 = vmatmul.mubr.msk.f32.vlgmr.msra.gmra.mrb[2].mxu1 %vm126_vm3, %v6054_v21 }
 0x1e2   :  { %5699 = vmatpush3.bf16.msra.mxu1 %v6293_v6  ;;  %5065 = vmatprep.mubr.msk.f32.mxu1 %vm6242_vm0, %v6241_v1 }
 0x1e3   :  { %5700 = vmatprep.subr.bf16.mxu1 %v6240_v0 }
 0x1e6   :  { %5702 = vmatpush3.bf16.msra.mxu1 %v6301_v9 }
 0x1e7   :  { %5709 = vmatprep.subr.bf16.mxu1 %v6240_v0 }
 0x2b4   :  { %v344_v22 = vpop.f32.mrb[2].mxu1 }
 0x2b5   :  { %v345_v23 = vadd.f32 %v344_v22, %v6324_v13  ;;  %v5045_v24 = vpop.f32.mrb[3].mxu1 }
 0x2b7   :  { %6055 = vtanh.f32 %v345_v23 }
 0x2c1   :  { %v6056_v25 = vpop.eup %6055 }
 0x2c2   :  { %5055 = vmatmul.mubr.msk.f32.vlgmr.msra.gmra.mrb[4].mxu0 %vm126_vm3, %v6056_v25 }
 0x2c3   :  { %5705 = vmatpush3.bf16.msra.mxu0 %v6293_v6  ;;  %5076 = vmatprep.mubr.msk.f32.mxu0 %vm6242_vm0, %v6241_v1 }
 0x2c4   :  { %5706 = vmatprep.subr.bf16.mxu0 %v6240_v0 }
 0x2c7   :  { %5708 = vmatpush3.bf16.msra.mxu0 %v6301_v9 }
 0x2c8   :  { %5715 = vmatprep.subr.bf16.mxu0 %v6240_v0 }
 0x395   :  { %v418_v26 = vpop.f32.mrb[4].mxu0 }
 0x396   :  { %v419_v27 = vadd.f32 %v418_v26, %v6324_v13  ;;  %v5056_v28 = vpop.f32.mrb[5].mxu0 }
 0x398   :  { %6057 = vtanh.f32 %v419_v27 }
 0x3a2   :  { %v6058_v29 = vpop.eup %6057 }
 0x3a3   :  { %5066 = vmatmul.mubr.msk.f32.vlgmr.msra.gmra.mrb[4].mxu1 %vm126_vm3, %v6058_v29 }
 0x3a4   :  { %5711 = vmatpush3.bf16.msra.mxu1 %v6293_v6  ;;  %5087 = vmatprep.mubr.msk.f32.mxu1 %vm6242_vm0, %v6241_v1 }
 0x3a5   :  { %5712 = vmatprep.subr.bf16.mxu1 %v6240_v0 }
 0x3a8   :  { %5714 = vmatpush3.bf16.msra.mxu1 %v6301_v9 }
 0x3a9   :  { %5721 = vmatprep.subr.bf16.mxu1 %v6240_v0 }
 0x476   :  { %v492_v30 = vpop.f32.mrb[4].mxu1 }
 0x477   :  { %v493_v31 = vadd.f32 %v492_v30, %v6324_v13  ;;  %v5067_v32 = vpop.f32.mrb[5].mxu1 }
 0x479   :  { %6059 = vtanh.f32 %v493_v31 }
 0x483   :  { %v6060_v33 = vpop.eup %6059 }
 0x484   :  { %5077 = vmatmul.mubr.msk.f32.vlgmr.msra.gmra.mrb[6].mxu0 %vm126_vm3, %v6060_v33 }
 0x485   :  { %5717 = vmatpush3.bf16.msra.mxu0 %v6293_v6  ;;  %5098 = vmatprep.mubr.msk.f32.mxu0 %vm6242_vm0, %v6241_v1 }
 0x486   :  { %5718 = vmatprep.subr.bf16.mxu0 %v6240_v0 }
 0x489   :  { %5720 = vmatpush3.bf16.msra.mxu0 %v6301_v9 }
 0x48a   :  { %5727 = vmatprep.subr.bf16.mxu0 %v6240_v0 }
 0x557   :  { %v566_v34 = vpop.f32.mrb[6].mxu0 }
 0x558   :  { %v567_v35 = vadd.f32 %v566_v34, %v6324_v13  ;;  %v5078_v36 = vpop.f32.mrb[7].mxu0 }
 0x55a   :  { %6061 = vtanh.f32 %v567_v35 }
 0x564   :  { %v6062_v37 = vpop.eup %6061 }
 0x565   :  { %5088 = vmatmul.mubr.msk.f32.vlgmr.msra.gmra.mrb[6].mxu1 %vm126_vm3, %v6062_v37 }
 0x566   :  { %5723 = vmatpush3.bf16.msra.mxu1 %v6293_v6  ;;  %5109 = vmatprep.mubr.msk.f32.mxu1 %vm6242_vm0, %v6241_v1 }
 0x567   :  { %5724 = vmatprep.subr.bf16.mxu1 %v6240_v0 }
 0x56a   :  { %5726 = vmatpush3.bf16.msra.mxu1 %v6301_v9 }
 0x56b   :  { %5733 = vmatprep.subr.bf16.mxu1 %v6240_v0 }
 0x638   :  { %v640_v38 = vpop.f32.mrb[6].mxu1 }
 0x639   :  { %v641_v39 = vadd.f32 %v640_v38, %v6324_v13  ;;  %v5089_v40 = vpop.f32.mrb[7].mxu1 }
 0x63b   :  { %6063 = vtanh.f32 %v641_v39 }
 0x645   :  { %v6064_v41 = vpop.eup %6063 }
 0x646   :  { %5099 = vmatmul.mubr.msk.f32.vlgmr.msra.gmra.mrb[8].mxu0 %vm126_vm3, %v6064_v41 }
 0x647   :  { %5729 = vmatpush3.bf16.msra.mxu0 %v6293_v6  ;;  %5120 = vmatprep.mubr.msk.f32.mxu0 %vm6242_vm0, %v6241_v1 }
 0x648   :  { %5730 = vmatprep.subr.bf16.mxu0 %v6240_v0 }
 0x64b   :  { %5732 = vmatpush3.bf16.msra.mxu0 %v6301_v9 }
 0x64c   :  { %5739 = vmatprep.subr.bf16.mxu0 %v6240_v0 }
 0x719   :  { %v714_v42 = vpop.f32.mrb[8].mxu0 }
 0x71a   :  { %v715_v43 = vadd.f32 %v714_v42, %v6324_v13  ;;  %v5100_v44 = vpop.f32.mrb[9].mxu0 }
 0x71c   :  { %6065 = vtanh.f32 %v715_v43 }
 0x726   :  { %v6066_v45 = vpop.eup %6065 }
 0x727   :  { %5110 = vmatmul.mubr.msk.f32.vlgmr.msra.gmra.mrb[8].mxu1 %vm126_vm3, %v6066_v45 }
 0x728   :  { %5735 = vmatpush3.bf16.msra.mxu1 %v6293_v6  ;;  %5131 = vmatprep.mubr.msk.f32.mxu1 %vm6242_vm0, %v6241_v1 }
 0x729   :  { %5736 = vmatprep.subr.bf16.mxu1 %v6240_v0 }
 0x72c   :  { %5738 = vmatpush3.bf16.msra.mxu1 %v6301_v9 }
 0x72d   :  { %5745 = vmatprep.subr.bf16.mxu1 %v6240_v0 }
 0x7fa   :  { %v788_v46 = vpop.f32.mrb[8].mxu1 }
 0x7fb   :  { %v789_v47 = vadd.f32 %v788_v46, %v6324_v13  ;;  %v5111_v48 = vpop.f32.mrb[9].mxu1 }
 0x7fd   :  { %6067 = vtanh.f32 %v789_v47 }
 0x807   :  { %v6068_v49 = vpop.eup %6067 }
 0x808   :  { %5121 = vmatmul.mubr.msk.f32.vlgmr.msra.gmra.mrb[10].mxu0 %vm126_vm3, %v6068_v49 }
 0x809   :  { %5741 = vmatpush3.bf16.msra.mxu0 %v6293_v6  ;;  %5142 = vmatprep.mubr.msk.f32.mxu0 %vm6242_vm0, %v6241_v1 }
 0x80a   :  { %5742 = vmatprep.subr.bf16.mxu0 %v6240_v0 }
 0x80d   :  { %5744 = vmatpush3.bf16.msra.mxu0 %v6301_v9 }
 0x80e   :  { %5751 = vmatprep.subr.bf16.mxu0 %v6240_v0 }
 0x8db   :  { %v862_v50 = vpop.f32.mrb[10].mxu0 }
 0x8dc   :  { %v863_v51 = vadd.f32 %v862_v50, %v6324_v13  ;;  %v5122_v52 = vpop.f32.mrb[11].mxu0 }
 0x8de   :  { %6069 = vtanh.f32 %v863_v51 }
 0x8e8   :  { %v6070_v53 = vpop.eup %6069 }
 0x8e9   :  { %5132 = vmatmul.mubr.msk.f32.vlgmr.msra.gmra.mrb[10].mxu1 %vm126_vm3, %v6070_v53 }
 0x8ea   :  { %5747 = vmatpush3.bf16.msra.mxu1 %v6293_v6  ;;  %5153 = vmatprep.mubr.msk.f32.mxu1 %vm6242_vm0, %v6241_v1 }
 0x8eb   :  { %5748 = vmatprep.subr.bf16.mxu1 %v6240_v0 }
 0x8ee   :  { %5750 = vmatpush3.bf16.msra.mxu1 %v6301_v9 }
 0x8ef   :  { %5757 = vmatprep.subr.bf16.mxu1 %v6240_v0 }
 0x9bc   :  { %v936_v54 = vpop.f32.mrb[10].mxu1 }
 0x9bd   :  { %v937_v55 = vadd.f32 %v936_v54, %v6324_v13  ;;  %v5133_v56 = vpop.f32.mrb[11].mxu1 }
 0x9bf   :  { %6071 = vtanh.f32 %v937_v55 }
 0x9c9   :  { %v6072_v57 = vpop.eup %6071 }
 0x9ca   :  { %5143 = vmatmul.mubr.msk.f32.vlgmr.msra.gmra.mrb[12].mxu0 %vm126_vm3, %v6072_v57 }
 0x9cb   :  { %5753 = vmatpush3.bf16.msra.mxu0 %v6293_v6  ;;  %5164 = vmatprep.mubr.msk.f32.mxu0 %vm6242_vm0, %v6241_v1 }
 0x9cc   :  { %5754 = vmatprep.subr.bf16.mxu0 %v6240_v0 }
 0x9cf   :  { %5756 = vmatpush3.bf16.msra.mxu0 %v6301_v9 }
 0x9d0   :  { %5763 = vmatprep.subr.bf16.mxu0 %v6240_v0 }
 0xa9d   :  { %v1010_v58 = vpop.f32.mrb[12].mxu0 }
 0xa9e   :  { %v1011_v59 = vadd.f32 %v1010_v58, %v6324_v13  ;;  %v5144_v60 = vpop.f32.mrb[13].mxu0 }
 0xaa0   :  { %6073 = vtanh.f32 %v1011_v59 }
 0xaaa   :  { %v6074_v61 = vpop.eup %6073 }
 0xaab   :  { %5154 = vmatmul.mubr.msk.f32.vlgmr.msra.gmra.mrb[12].mxu1 %vm126_vm3, %v6074_v61 }
 0xaac   :  { %5759 = vmatpush3.bf16.msra.mxu1 %v6293_v6  ;;  %5175 = vmatprep.mubr.msk.f32.mxu1 %vm6242_vm0, %v6241_v1 }
 0xaad   :  { %5760 = vmatprep.subr.bf16.mxu1 %v6240_v0 }
 0xab0   :  { %5762 = vmatpush3.bf16.msra.mxu1 %v6301_v9 }
 0xab1   :  { %5769 = vmatprep.subr.bf16.mxu1 %v6240_v0 }
 0xb7e   :  { %v1084_v62 = vpop.f32.mrb[12].mxu1 }
 0xb7f   :  { %v1085_v63 = vadd.f32 %v1084_v62, %v6324_v13  ;;  %v5155_v2 = vpop.f32.mrb[13].mxu1 }
 0xb81   :  { %6075 = vtanh.f32 %v1085_v63 }
 0xb8b   :  { %v6076_v3 = vpop.eup %6075 }
 0xb8c   :  { %5165 = vmatmul.mubr.msk.f32.vlgmr.msra.gmra.mrb[14].mxu0 %vm126_vm3, %v6076_v3 }
 0xb8d   :  { %5765 = vmatpush3.bf16.msra.mxu0 %v6293_v6  ;;  %5186 = vmatprep.mubr.msk.f32.mxu0 %vm6242_vm0, %v6241_v1 }
 0xb8e   :  { %5766 = vmatprep.subr.bf16.mxu0 %v6240_v0 }
 0xb91   :  { %5768 = vmatpush3.bf16.msra.mxu0 %v6301_v9 }
 0xb92   :  { %5775 = vmatprep.subr.bf16.mxu0 %v6240_v0 }
 0xc5f   :  { %v1158_v4 = vpop.f32.mrb[14].mxu0 }
 0xc60   :  { %v1159_v5 = vadd.f32 %v1158_v4, %v6324_v13  ;;  %v5166_v7 = vpop.f32.mrb[15].mxu0 }
 0xc62   :  { %6077 = vtanh.f32 %v1159_v5 }
 0xc6c   :  { %v6078_v8 = vpop.eup %6077 }
 0xc6d   :  { %5176 = vmatmul.mubr.msk.f32.vlgmr.msra.gmra.mrb[14].mxu1 %vm126_vm3, %v6078_v8 }
 0xc6e   :  { %5771 = vmatpush3.bf16.msra.mxu1 %v6293_v6  ;;  %5197 = vmatprep.mubr.msk.f32.mxu1 %vm6242_vm0, %v6241_v1 }
 0xc6f   :  { %5772 = vmatprep.subr.bf16.mxu1 %v6240_v0 }
 0xc72   :  { %5774 = vmatpush3.bf16.msra.mxu1 %v6301_v9 }
 0xc73   :  { %5781 = vmatprep.subr.bf16.mxu1 %v6240_v0 }
 0xd40   :  { %v1232_v10 = vpop.f32.mrb[14].mxu1 }
 0xd41   :  { %v1233_v11 = vadd.f32 %v1232_v10, %v6324_v13  ;;  %v5177_v12 = vpop.f32.mrb[15].mxu1 }
 0xd43   :  { %6079 = vtanh.f32 %v1233_v11 }
 0xd4d   :  { %v6080_v14 = vpop.eup %6079 }
 0xd4e   :  { %5187 = vmatmul.mubr.msk.f32.vlgmr.msra.gmra.mrb[16].mxu0 %vm126_vm3, %v6080_v14 }
 0xd4f   :  { %5777 = vmatpush3.bf16.msra.mxu0 %v6293_v6  ;;  %5208 = vmatprep.mubr.msk.f32.mxu0 %vm6242_vm0, %v6241_v1 }
 0xd50   :  { %5778 = vmatprep.subr.bf16.mxu0 %v6240_v0 }
 0xd53   :  { %5780 = vmatpush3.bf16.msra.mxu0 %v6301_v9 }
 0xd54   :  { %5787 = vmatprep.subr.bf16.mxu0 %v6240_v0 }
 0xe21   :  { %v1306_v15 = vpop.f32.mrb[16].mxu0 }
 0xe22   :  { %v1307_v16 = vadd.f32 %v1306_v15, %v6324_v13  ;;  %v5188_v17 = vpop.f32.mrb[17].mxu0 }
 0xe24   :  { %6081 = vtanh.f32 %v1307_v16 }
 0xe2e   :  { %v6082_v18 = vpop.eup %6081 }
 0xe2f   :  { %5198 = vmatmul.mubr.msk.f32.vlgmr.msra.gmra.mrb[16].mxu1 %vm126_vm3, %v6082_v18 }
 0xe30   :  { %5783 = vmatpush3.bf16.msra.mxu1 %v6293_v6  ;;  %5219 = vmatprep.mubr.msk.f32.mxu1 %vm6242_vm0, %v6241_v1 }
 0xe31   :  { %5784 = vmatprep.subr.bf16.mxu1 %v6240_v0 }
 0xe34   :  { %5786 = vmatpush3.bf16.msra.mxu1 %v6301_v9 }
 0xe35   :  { %5793 = vmatprep.subr.bf16.mxu1 %v6240_v0 }
 0xf02   :  { %v1380_v19 = vpop.f32.mrb[16].mxu1 }
 0xf03   :  { %v1381_v20 = vadd.f32 %v1380_v19, %v6324_v13  ;;  %v5199_v21 = vpop.f32.mrb[17].mxu1 }
 0xf05   :  { %6083 = vtanh.f32 %v1381_v20 }
 0xf0f   :  { %v6084_v22 = vpop.eup %6083 }
 0xf10   :  { %5209 = vmatmul.mubr.msk.f32.vlgmr.msra.gmra.mrb[18].mxu0 %vm126_vm3, %v6084_v22 }
 0xf11   :  { %5789 = vmatpush3.bf16.msra.mxu0 %v6293_v6  ;;  %5230 = vmatprep.mubr.msk.f32.mxu0 %vm6242_vm0, %v6241_v1 }
 0xf12   :  { %5790 = vmatprep.subr.bf16.mxu0 %v6240_v0 }
 0xf15   :  { %5792 = vmatpush3.bf16.msra.mxu0 %v6301_v9 }
 0xf16   :  { %5799 = vmatprep.subr.bf16.mxu0 %v6240_v0 }
 0xfe3   :  { %v1454_v23 = vpop.f32.mrb[18].mxu0 }
 0xfe4   :  { %v1455_v24 = vadd.f32 %v1454_v23, %v6324_v13  ;;  %v5210_v25 = vpop.f32.mrb[19].mxu0 }
 0xfe6   :  { %6085 = vtanh.f32 %v1455_v24 }
 0xff0   :  { %v6086_v26 = vpop.eup %6085 }
 0xff1   :  { %5220 = vmatmul.mubr.msk.f32.vlgmr.msra.gmra.mrb[18].mxu1 %vm126_vm3, %v6086_v26 }
 0xff2   :  { %5795 = vmatpush3.bf16.msra.mxu1 %v6293_v6  ;;  %5241 = vmatprep.mubr.msk.f32.mxu1 %vm6242_vm0, %v6241_v1 }
 0xff3   :  { %5796 = vmatprep.subr.bf16.mxu1 %v6240_v0 }
 0xff6   :  { %5798 = vmatpush3.bf16.msra.mxu1 %v6301_v9 }
 0xff7   :  { %5805 = vmatprep.subr.bf16.mxu1 %v6240_v0 }
0x10c4   :  { %v1528_v27 = vpop.f32.mrb[18].mxu1 }
0x10c5   :  { %v1529_v28 = vadd.f32 %v1528_v27, %v6324_v13  ;;  %v5221_v29 = vpop.f32.mrb[19].mxu1 }
0x10c7   :  { %6087 = vtanh.f32 %v1529_v28 }
0x10d1   :  { %v6088_v30 = vpop.eup %6087 }
0x10d2   :  { %5231 = vmatmul.mubr.msk.f32.vlgmr.msra.gmra.mrb[20].mxu0 %vm126_vm3, %v6088_v30 }
0x10d3   :  { %5801 = vmatpush3.bf16.msra.mxu0 %v6293_v6  ;;  %5252 = vmatprep.mubr.msk.f32.mxu0 %vm6242_vm0, %v6241_v1 }
0x10d4   :  { %5802 = vmatprep.subr.bf16.mxu0 %v6240_v0 }
0x10d7   :  { %5804 = vmatpush3.bf16.msra.mxu0 %v6301_v9 }
0x10d8   :  { %5811 = vmatprep.subr.bf16.mxu0 %v6240_v0 }
0x11a5   :  { %v1602_v31 = vpop.f32.mrb[20].mxu0 }
0x11a6   :  { %v1603_v32 = vadd.f32 %v1602_v31, %v6324_v13  ;;  %v5232_v33 = vpop.f32.mrb[21].mxu0 }
0x11a8   :  { %6089 = vtanh.f32 %v1603_v32 }
0x11b2   :  { %v6090_v34 = vpop.eup %6089 }
0x11b3   :  { %5242 = vmatmul.mubr.msk.f32.vlgmr.msra.gmra.mrb[20].mxu1 %vm126_vm3, %v6090_v34 }
0x11b4   :  { %5807 = vmatpush3.bf16.msra.mxu1 %v6293_v6  ;;  %5263 = vmatprep.mubr.msk.f32.mxu1 %vm6242_vm0, %v6241_v1 }
0x11b5   :  { %5808 = vmatprep.subr.bf16.mxu1 %v6240_v0 }
0x11b8   :  { %5810 = vmatpush3.bf16.msra.mxu1 %v6301_v9 }
0x11b9   :  { %5817 = vmatprep.subr.bf16.mxu1 %v6240_v0 }
0x1286   :  { %v1676_v35 = vpop.f32.mrb[20].mxu1 }
0x1287   :  { %v1677_v36 = vadd.f32 %v1676_v35, %v6324_v13  ;;  %v5243_v37 = vpop.f32.mrb[21].mxu1 }
0x1289   :  { %6091 = vtanh.f32 %v1677_v36 }
0x1293   :  { %v6092_v38 = vpop.eup %6091 }
0x1294   :  { %5253 = vmatmul.mubr.msk.f32.vlgmr.msra.gmra.mrb[22].mxu0 %vm126_vm3, %v6092_v38 }
0x1295   :  { %5813 = vmatpush3.bf16.msra.mxu0 %v6293_v6  ;;  %5274 = vmatprep.mubr.msk.f32.mxu0 %vm6242_vm0, %v6241_v1 }
0x1296   :  { %5814 = vmatprep.subr.bf16.mxu0 %v6240_v0 }
0x1299   :  { %5816 = vmatpush3.bf16.msra.mxu0 %v6301_v9 }
0x129a   :  { %5823 = vmatprep.subr.bf16.mxu0 %v6240_v0 }
0x1367   :  { %v1750_v39 = vpop.f32.mrb[22].mxu0 }
0x1368   :  { %v1751_v40 = vadd.f32 %v1750_v39, %v6324_v13  ;;  %v5254_v41 = vpop.f32.mrb[23].mxu0 }
0x136a   :  { %6093 = vtanh.f32 %v1751_v40 }
0x1374   :  { %v6094_v42 = vpop.eup %6093 }
0x1375   :  { %5264 = vmatmul.mubr.msk.f32.vlgmr.msra.gmra.mrb[22].mxu1 %vm126_vm3, %v6094_v42 }
0x1376   :  { %5819 = vmatpush3.bf16.msra.mxu1 %v6293_v6  ;;  %5285 = vmatprep.mubr.msk.f32.mxu1 %vm6242_vm0, %v6241_v1 }
0x1377   :  { %5820 = vmatprep.subr.bf16.mxu1 %v6240_v0 }
0x137a   :  { %5822 = vmatpush3.bf16.msra.mxu1 %v6301_v9 }
0x137b   :  { %5829 = vmatprep.subr.bf16.mxu1 %v6240_v0 }
0x1448   :  { %v1824_v43 = vpop.f32.mrb[22].mxu1 }
0x1449   :  { %v1825_v44 = vadd.f32 %v1824_v43, %v6324_v13  ;;  %v5265_v45 = vpop.f32.mrb[23].mxu1 }
0x144b   :  { %6095 = vtanh.f32 %v1825_v44 }
0x1455   :  { %v6096_v46 = vpop.eup %6095 }
0x1456   :  { %5275 = vmatmul.mubr.msk.f32.vlgmr.msra.gmra.mrb[24].mxu0 %vm126_vm3, %v6096_v46 }
0x1457   :  { %5825 = vmatpush3.bf16.msra.mxu0 %v6293_v6  ;;  %5296 = vmatprep.mubr.msk.f32.mxu0 %vm6242_vm0, %v6241_v1 }
0x1458   :  { %5826 = vmatprep.subr.bf16.mxu0 %v6240_v0 }
0x145b   :  { %5828 = vmatpush3.bf16.msra.mxu0 %v6301_v9 }
0x145c   :  { %5835 = vmatprep.subr.bf16.mxu0 %v6240_v0 }
0x1529   :  { %v1898_v47 = vpop.f32.mrb[24].mxu0 }
0x152a   :  { %v1899_v48 = vadd.f32 %v1898_v47, %v6324_v13  ;;  %v5276_v49 = vpop.f32.mrb[25].mxu0 }
0x152c   :  { %6097 = vtanh.f32 %v1899_v48 }
0x1536   :  { %v6098_v50 = vpop.eup %6097 }
0x1537   :  { %5286 = vmatmul.mubr.msk.f32.vlgmr.msra.gmra.mrb[24].mxu1 %vm126_vm3, %v6098_v50 }
0x1538   :  { %5831 = vmatpush3.bf16.msra.mxu1 %v6293_v6  ;;  %5307 = vmatprep.mubr.msk.f32.mxu1 %vm6242_vm0, %v6241_v1 }
0x1539   :  { %5832 = vmatprep.subr.bf16.mxu1 %v6240_v0 }
0x153c   :  { %5834 = vmatpush3.bf16.msra.mxu1 %v6301_v9 }
0x153d   :  { %5841 = vmatprep.subr.bf16.mxu1 %v6240_v0 }
0x160a   :  { %v1972_v51 = vpop.f32.mrb[24].mxu1 }
0x160b   :  { %v1973_v52 = vadd.f32 %v1972_v51, %v6324_v13  ;;  %v5287_v53 = vpop.f32.mrb[25].mxu1 }
0x160d   :  { %6099 = vtanh.f32 %v1973_v52 }
0x1617   :  { %v6100_v54 = vpop.eup %6099 }
0x1618   :  { %5297 = vmatmul.mubr.msk.f32.vlgmr.msra.gmra.mrb[26].mxu0 %vm126_vm3, %v6100_v54 }
0x1619   :  { %5837 = vmatpush3.bf16.msra.mxu0 %v6293_v6  ;;  %5318 = vmatprep.mubr.msk.f32.mxu0 %vm6242_vm0, %v6241_v1 }
0x161a   :  { %5838 = vmatprep.subr.bf16.mxu0 %v6240_v0 }
0x161d   :  { %5840 = vmatpush3.bf16.msra.mxu0 %v6301_v9 }
0x161e   :  { %5847 = vmatprep.subr.bf16.mxu0 %v6240_v0 }
0x16eb   :  { %v2046_v55 = vpop.f32.mrb[26].mxu0 }
0x16ec   :  { %v2047_v56 = vadd.f32 %v2046_v55, %v6324_v13  ;;  %v5298_v57 = vpop.f32.mrb[27].mxu0 }
0x16ee   :  { %6101 = vtanh.f32 %v2047_v56 }
0x16f8   :  { %v6102_v58 = vpop.eup %6101 }
0x16f9   :  { %5308 = vmatmul.mubr.msk.f32.vlgmr.msra.gmra.mrb[26].mxu1 %vm126_vm3, %v6102_v58 }
0x16fa   :  { %5843 = vmatpush3.bf16.msra.mxu1 %v6293_v6  ;;  %5329 = vmatprep.mubr.msk.f32.mxu1 %vm6242_vm0, %v6241_v1 }
0x16fb   :  { %5844 = vmatprep.subr.bf16.mxu1 %v6240_v0 }
0x16fe   :  { %5846 = vmatpush3.bf16.msra.mxu1 %v6301_v9 }
0x16ff   :  { %5853 = vmatprep.subr.bf16.mxu1 %v6240_v0 }
0x17cc   :  { %v2120_v59 = vpop.f32.mrb[26].mxu1 }
0x17cd   :  { %v2121_v60 = vadd.f32 %v2120_v59, %v6324_v13  ;;  %v5309_v61 = vpop.f32.mrb[27].mxu1 }
0x17cf   :  { %6103 = vtanh.f32 %v2121_v60 }
0x17d9   :  { %v6104_v62 = vpop.eup %6103 }
0x17da   :  { %5319 = vmatmul.mubr.msk.f32.vlgmr.msra.gmra.mrb[28].mxu0 %vm126_vm3, %v6104_v62 }
0x17db   :  { %5849 = vmatpush3.bf16.msra.mxu0 %v6293_v6  ;;  %5340 = vmatprep.mubr.msk.f32.mxu0 %vm6242_vm0, %v6241_v1 }
0x17dc   :  { %5850 = vmatprep.subr.bf16.mxu0 %v6240_v0 }
0x17df   :  { %5852 = vmatpush3.bf16.msra.mxu0 %v6301_v9 }
0x17e0   :  { %5859 = vmatprep.subr.bf16.mxu0 %v6240_v0 }
0x18ad   :  { %v2194_v63 = vpop.f32.mrb[28].mxu0 }
0x18ae   :  { %v2195_v2 = vadd.f32 %v2194_v63, %v6324_v13  ;;  %v5320_v3 = vpop.f32.mrb[29].mxu0 }
0x18b0   :  { %6105 = vtanh.f32 %v2195_v2 }
0x18ba   :  { %v6106_v4 = vpop.eup %6105 }
0x18bb   :  { %5330 = vmatmul.mubr.msk.f32.vlgmr.msra.gmra.mrb[28].mxu1 %vm126_vm3, %v6106_v4 }
0x18bc   :  { %5855 = vmatpush3.bf16.msra.mxu1 %v6293_v6  ;;  %5351 = vmatprep.mubr.msk.f32.mxu1 %vm6242_vm0, %v6241_v1 }
0x18bd   :  { %5856 = vmatprep.subr.bf16.mxu1 %v6240_v0 }
0x18c0   :  { %5858 = vmatpush3.bf16.msra.mxu1 %v6301_v9 }
0x18c1   :  { %5865 = vmatprep.subr.bf16.mxu1 %v6240_v0 }
0x198e   :  { %v2268_v5 = vpop.f32.mrb[28].mxu1 }
0x198f   :  { %v2269_v7 = vadd.f32 %v2268_v5, %v6324_v13  ;;  %v5331_v8 = vpop.f32.mrb[29].mxu1 }
0x1991   :  { %6107 = vtanh.f32 %v2269_v7 }
0x199b   :  { %v6108_v10 = vpop.eup %6107 }
0x199c   :  { %5341 = vmatmul.mubr.msk.f32.vlgmr.msra.gmra.mrb[30].mxu0 %vm126_vm3, %v6108_v10 }
0x199d   :  { %5861 = vmatpush3.bf16.msra.mxu0 %v6293_v6  ;;  %5362 = vmatprep.mubr.msk.f32.mxu0 %vm6242_vm0, %v6241_v1 }
0x199e   :  { %5862 = vmatprep.subr.bf16.mxu0 %v6240_v0 }
0x19a1   :  { %5864 = vmatpush3.bf16.msra.mxu0 %v6301_v9 }
0x19a2   :  { %5871 = vmatprep.subr.bf16.mxu0 %v6240_v0 }
0x1a6f   :  { %v2342_v11 = vpop.f32.mrb[30].mxu0 }
0x1a70   :  { %v2343_v12 = vadd.f32 %v2342_v11, %v6324_v13  ;;  %v5342_v14 = vpop.f32.mrb[31].mxu0 }
0x1a72   :  { %6109 = vtanh.f32 %v2343_v12 }
0x1a7c   :  { %v6110_v15 = vpop.eup %6109 }
0x1a7d   :  { %5352 = vmatmul.mubr.msk.f32.vlgmr.msra.gmra.mrb[30].mxu1 %vm126_vm3, %v6110_v15 }
0x1a7e   :  { %5867 = vmatpush3.bf16.msra.mxu1 %v6293_v6  ;;  %5373 = vmatprep.mubr.msk.f32.mxu1 %vm6242_vm0, %v6241_v1 }
0x1a7f   :  { %5868 = vmatprep.subr.bf16.mxu1 %v6240_v0 }
0x1a82   :  { %5870 = vmatpush3.bf16.msra.mxu1 %v6301_v9 }
0x1a83   :  { %5877 = vmatprep.subr.bf16.mxu1 %v6240_v0 }
0x1b50   :  { %v2416_v16 = vpop.f32.mrb[30].mxu1 }
0x1b51   :  { %v2417_v17 = vadd.f32 %v2416_v16, %v6324_v13  ;;  %v5353_v18 = vpop.f32.mrb[31].mxu1 }
0x1b53   :  { %6111 = vtanh.f32 %v2417_v17 }
0x1b5d   :  { %v6112_v19 = vpop.eup %6111 }
0x1b5e   :  { %5363 = vmatmul.mubr.msk.f32.vlgmr.msra.gmra.mrb[32].mxu0 %vm126_vm3, %v6112_v19 }
0x1b5f   :  { %5873 = vmatpush3.bf16.msra.mxu0 %v6293_v6  ;;  %5384 = vmatprep.mubr.msk.f32.mxu0 %vm6242_vm0, %v6241_v1 }
0x1b60   :  { %5874 = vmatprep.subr.bf16.mxu0 %v6240_v0 }
0x1b63   :  { %5876 = vmatpush3.bf16.msra.mxu0 %v6301_v9 }
0x1b64   :  { %5883 = vmatprep.subr.bf16.mxu0 %v6240_v0 }
0x1c31   :  { %v2490_v20 = vpop.f32.mrb[32].mxu0 }
0x1c32   :  { %v2491_v21 = vadd.f32 %v2490_v20, %v6324_v13  ;;  %v5364_v22 = vpop.f32.mrb[33].mxu0 }
0x1c34   :  { %6113 = vtanh.f32 %v2491_v21 }
0x1c3e   :  { %v6114_v23 = vpop.eup %6113 }
0x1c3f   :  { %5374 = vmatmul.mubr.msk.f32.vlgmr.msra.gmra.mrb[32].mxu1 %vm126_vm3, %v6114_v23 }
0x1c40   :  { %5879 = vmatpush3.bf16.msra.mxu1 %v6293_v6  ;;  %5395 = vmatprep.mubr.msk.f32.mxu1 %vm6242_vm0, %v6241_v1 }
0x1c41   :  { %5880 = vmatprep.subr.bf16.mxu1 %v6240_v0 }
0x1c44   :  { %5882 = vmatpush3.bf16.msra.mxu1 %v6301_v9 }
0x1c45   :  { %5889 = vmatprep.subr.bf16.mxu1 %v6240_v0 }
0x1d12   :  { %v2564_v24 = vpop.f32.mrb[32].mxu1 }
0x1d13   :  { %v2565_v25 = vadd.f32 %v2564_v24, %v6324_v13  ;;  %v5375_v26 = vpop.f32.mrb[33].mxu1 }
0x1d15   :  { %6115 = vtanh.f32 %v2565_v25 }
0x1d1f   :  { %v6116_v27 = vpop.eup %6115 }
0x1d20   :  { %5385 = vmatmul.mubr.msk.f32.vlgmr.msra.gmra.mrb[34].mxu0 %vm126_vm3, %v6116_v27 }
0x1d21   :  { %5885 = vmatpush3.bf16.msra.mxu0 %v6293_v6  ;;  %5406 = vmatprep.mubr.msk.f32.mxu0 %vm6242_vm0, %v6241_v1 }
0x1d22   :  { %5886 = vmatprep.subr.bf16.mxu0 %v6240_v0 }
0x1d25   :  { %5888 = vmatpush3.bf16.msra.mxu0 %v6301_v9 }
0x1d26   :  { %5895 = vmatprep.subr.bf16.mxu0 %v6240_v0 }
0x1df3   :  { %v2638_v28 = vpop.f32.mrb[34].mxu0 }
0x1df4   :  { %v2639_v29 = vadd.f32 %v2638_v28, %v6324_v13  ;;  %v5386_v30 = vpop.f32.mrb[35].mxu0 }
0x1df6   :  { %6117 = vtanh.f32 %v2639_v29 }
0x1e00   :  { %v6118_v31 = vpop.eup %6117 }
0x1e01   :  { %5396 = vmatmul.mubr.msk.f32.vlgmr.msra.gmra.mrb[34].mxu1 %vm126_vm3, %v6118_v31 }
0x1e02   :  { %5891 = vmatpush3.bf16.msra.mxu1 %v6293_v6  ;;  %5417 = vmatprep.mubr.msk.f32.mxu1 %vm6242_vm0, %v6241_v1 }
0x1e03   :  { %5892 = vmatprep.subr.bf16.mxu1 %v6240_v0 }
0x1e06   :  { %5894 = vmatpush3.bf16.msra.mxu1 %v6301_v9 }
0x1e07   :  { %5901 = vmatprep.subr.bf16.mxu1 %v6240_v0 }
0x1ed4   :  { %v2712_v32 = vpop.f32.mrb[34].mxu1 }
0x1ed5   :  { %v2713_v33 = vadd.f32 %v2712_v32, %v6324_v13  ;;  %v5397_v34 = vpop.f32.mrb[35].mxu1 }
0x1ed7   :  { %6119 = vtanh.f32 %v2713_v33 }
0x1ee1   :  { %v6120_v35 = vpop.eup %6119 }
0x1ee2   :  { %5407 = vmatmul.mubr.msk.f32.vlgmr.msra.gmra.mrb[36].mxu0 %vm126_vm3, %v6120_v35 }
0x1ee3   :  { %5897 = vmatpush3.bf16.msra.mxu0 %v6293_v6  ;;  %5428 = vmatprep.mubr.msk.f32.mxu0 %vm6242_vm0, %v6241_v1 }
0x1ee4   :  { %5898 = vmatprep.subr.bf16.mxu0 %v6240_v0 }
0x1ee7   :  { %5900 = vmatpush3.bf16.msra.mxu0 %v6301_v9 }
0x1ee8   :  { %5907 = vmatprep.subr.bf16.mxu0 %v6240_v0 }
0x1fb5   :  { %v2786_v36 = vpop.f32.mrb[36].mxu0 }
0x1fb6   :  { %v2787_v37 = vadd.f32 %v2786_v36, %v6324_v13  ;;  %v5408_v38 = vpop.f32.mrb[37].mxu0 }
0x1fb8   :  { %6121 = vtanh.f32 %v2787_v37 }
0x1fc2   :  { %v6122_v39 = vpop.eup %6121 }
0x1fc3   :  { %5418 = vmatmul.mubr.msk.f32.vlgmr.msra.gmra.mrb[36].mxu1 %vm126_vm3, %v6122_v39 }
0x1fc4   :  { %5903 = vmatpush3.bf16.msra.mxu1 %v6293_v6  ;;  %5439 = vmatprep.mubr.msk.f32.mxu1 %vm6242_vm0, %v6241_v1 }
0x1fc5   :  { %5904 = vmatprep.subr.bf16.mxu1 %v6240_v0 }
0x1fc8   :  { %5906 = vmatpush3.bf16.msra.mxu1 %v6301_v9 }
0x1fc9   :  { %5913 = vmatprep.subr.bf16.mxu1 %v6240_v0 }
0x2096   :  { %v2860_v40 = vpop.f32.mrb[36].mxu1 }
0x2097   :  { %v2861_v41 = vadd.f32 %v2860_v40, %v6324_v13  ;;  %v5419_v42 = vpop.f32.mrb[37].mxu1 }
0x2099   :  { %6123 = vtanh.f32 %v2861_v41 }
0x20a3   :  { %v6124_v43 = vpop.eup %6123 }
0x20a4   :  { %5429 = vmatmul.mubr.msk.f32.vlgmr.msra.gmra.mrb[38].mxu0 %vm126_vm3, %v6124_v43 }
0x20a5   :  { %5909 = vmatpush3.bf16.msra.mxu0 %v6293_v6  ;;  %5450 = vmatprep.mubr.msk.f32.mxu0 %vm6242_vm0, %v6241_v1 }
0x20a6   :  { %5910 = vmatprep.subr.bf16.mxu0 %v6240_v0 }
0x20a9   :  { %5912 = vmatpush3.bf16.msra.mxu0 %v6301_v9 }
0x20aa   :  { %5919 = vmatprep.subr.bf16.mxu0 %v6240_v0 }
0x2177   :  { %v2934_v44 = vpop.f32.mrb[38].mxu0 }
0x2178   :  { %v2935_v45 = vadd.f32 %v2934_v44, %v6324_v13  ;;  %v5430_v46 = vpop.f32.mrb[39].mxu0 }
0x217a   :  { %6125 = vtanh.f32 %v2935_v45 }
0x2184   :  { %v6126_v47 = vpop.eup %6125 }
0x2185   :  { %5440 = vmatmul.mubr.msk.f32.vlgmr.msra.gmra.mrb[38].mxu1 %vm126_vm3, %v6126_v47 }
0x2186   :  { %5915 = vmatpush3.bf16.msra.mxu1 %v6293_v6  ;;  %5461 = vmatprep.mubr.msk.f32.mxu1 %vm6242_vm0, %v6241_v1 }
0x2187   :  { %5916 = vmatprep.subr.bf16.mxu1 %v6240_v0 }
0x218a   :  { %5918 = vmatpush3.bf16.msra.mxu1 %v6301_v9 }
0x218b   :  { %5925 = vmatprep.subr.bf16.mxu1 %v6240_v0 }
0x2258   :  { %v3008_v48 = vpop.f32.mrb[38].mxu1 }
0x2259   :  { %v3009_v49 = vadd.f32 %v3008_v48, %v6324_v13  ;;  %v5441_v50 = vpop.f32.mrb[39].mxu1 }
0x225b   :  { %6127 = vtanh.f32 %v3009_v49 }
0x2265   :  { %v6128_v51 = vpop.eup %6127 }
0x2266   :  { %5451 = vmatmul.mubr.msk.f32.vlgmr.msra.gmra.mrb[40].mxu0 %vm126_vm3, %v6128_v51 }
0x2267   :  { %5921 = vmatpush3.bf16.msra.mxu0 %v6293_v6  ;;  %5472 = vmatprep.mubr.msk.f32.mxu0 %vm6242_vm0, %v6241_v1 }
0x2268   :  { %5922 = vmatprep.subr.bf16.mxu0 %v6240_v0 }
0x226b   :  { %5924 = vmatpush3.bf16.msra.mxu0 %v6301_v9 }
0x226c   :  { %5931 = vmatprep.subr.bf16.mxu0 %v6240_v0 }
0x2339   :  { %v3082_v52 = vpop.f32.mrb[40].mxu0 }
0x233a   :  { %v3083_v53 = vadd.f32 %v3082_v52, %v6324_v13  ;;  %v5452_v54 = vpop.f32.mrb[41].mxu0 }
0x233c   :  { %6129 = vtanh.f32 %v3083_v53 }
0x2346   :  { %v6130_v55 = vpop.eup %6129 }
0x2347   :  { %5462 = vmatmul.mubr.msk.f32.vlgmr.msra.gmra.mrb[40].mxu1 %vm126_vm3, %v6130_v55 }
0x2348   :  { %5927 = vmatpush3.bf16.msra.mxu1 %v6293_v6  ;;  %5483 = vmatprep.mubr.msk.f32.mxu1 %vm6242_vm0, %v6241_v1 }
0x2349   :  { %5928 = vmatprep.subr.bf16.mxu1 %v6240_v0 }
0x234c   :  { %5930 = vmatpush3.bf16.msra.mxu1 %v6301_v9 }
0x234d   :  { %5937 = vmatprep.subr.bf16.mxu1 %v6240_v0 }
0x241a   :  { %v3156_v56 = vpop.f32.mrb[40].mxu1 }
0x241b   :  { %v3157_v57 = vadd.f32 %v3156_v56, %v6324_v13  ;;  %v5463_v58 = vpop.f32.mrb[41].mxu1 }
0x241d   :  { %6131 = vtanh.f32 %v3157_v57 }
0x2427   :  { %v6132_v59 = vpop.eup %6131 }
0x2428   :  { %5473 = vmatmul.mubr.msk.f32.vlgmr.msra.gmra.mrb[42].mxu0 %vm126_vm3, %v6132_v59 }
0x2429   :  { %5933 = vmatpush3.bf16.msra.mxu0 %v6293_v6  ;;  %5494 = vmatprep.mubr.msk.f32.mxu0 %vm6242_vm0, %v6241_v1 }
0x242a   :  { %5934 = vmatprep.subr.bf16.mxu0 %v6240_v0 }
0x242d   :  { %5936 = vmatpush3.bf16.msra.mxu0 %v6301_v9 }
0x242e   :  { %5943 = vmatprep.subr.bf16.mxu0 %v6240_v0 }
0x24fb   :  { %v3230_v60 = vpop.f32.mrb[42].mxu0 }
0x24fc   :  { %v3231_v61 = vadd.f32 %v3230_v60, %v6324_v13  ;;  %v5474_v62 = vpop.f32.mrb[43].mxu0 }
0x24fe   :  { %6133 = vtanh.f32 %v3231_v61 }
0x2508   :  { %v6134_v63 = vpop.eup %6133 }
0x2509   :  { %5484 = vmatmul.mubr.msk.f32.vlgmr.msra.gmra.mrb[42].mxu1 %vm126_vm3, %v6134_v63 }
0x250a   :  { %5939 = vmatpush3.bf16.msra.mxu1 %v6293_v6  ;;  %5505 = vmatprep.mubr.msk.f32.mxu1 %vm6242_vm0, %v6241_v1 }
0x250b   :  { %5940 = vmatprep.subr.bf16.mxu1 %v6240_v0 }
0x250e   :  { %5942 = vmatpush3.bf16.msra.mxu1 %v6301_v9 }
0x250f   :  { %5949 = vmatprep.subr.bf16.mxu1 %v6240_v0 }
0x25dc   :  { %v3304_v2 = vpop.f32.mrb[42].mxu1 }
0x25dd   :  { %v3305_v3 = vadd.f32 %v3304_v2, %v6324_v13  ;;  %v5485_v4 = vpop.f32.mrb[43].mxu1 }
0x25df   :  { %6135 = vtanh.f32 %v3305_v3 }
0x25e9   :  { %v6136_v5 = vpop.eup %6135 }
0x25ea   :  { %5495 = vmatmul.mubr.msk.f32.vlgmr.msra.gmra.mrb[44].mxu0 %vm126_vm3, %v6136_v5 }
0x25eb   :  { %5945 = vmatpush3.bf16.msra.mxu0 %v6293_v6  ;;  %5516 = vmatprep.mubr.msk.f32.mxu0 %vm6242_vm0, %v6241_v1 }
0x25ec   :  { %5946 = vmatprep.subr.bf16.mxu0 %v6240_v0 }
0x25ef   :  { %5948 = vmatpush3.bf16.msra.mxu0 %v6301_v9 }
0x25f0   :  { %5955 = vmatprep.subr.bf16.mxu0 %v6240_v0 }
0x26bd   :  { %v3378_v7 = vpop.f32.mrb[44].mxu0 }
0x26be   :  { %v3379_v8 = vadd.f32 %v3378_v7, %v6324_v13  ;;  %v5496_v10 = vpop.f32.mrb[45].mxu0 }
0x26c0   :  { %6137 = vtanh.f32 %v3379_v8 }
0x26ca   :  { %v6138_v11 = vpop.eup %6137 }
0x26cb   :  { %5506 = vmatmul.mubr.msk.f32.vlgmr.msra.gmra.mrb[44].mxu1 %vm126_vm3, %v6138_v11 }
0x26cc   :  { %5951 = vmatpush3.bf16.msra.mxu1 %v6293_v6  ;;  %5527 = vmatprep.mubr.msk.f32.mxu1 %vm6242_vm0, %v6241_v1 }
0x26cd   :  { %5952 = vmatprep.subr.bf16.mxu1 %v6240_v0 }
0x26d0   :  { %5954 = vmatpush3.bf16.msra.mxu1 %v6301_v9 }
0x26d1   :  { %5961 = vmatprep.subr.bf16.mxu1 %v6240_v0 }
0x279e   :  { %v3452_v12 = vpop.f32.mrb[44].mxu1 }
0x279f   :  { %v3453_v14 = vadd.f32 %v3452_v12, %v6324_v13  ;;  %v5507_v15 = vpop.f32.mrb[45].mxu1 }
0x27a1   :  { %6139 = vtanh.f32 %v3453_v14 }
0x27ab   :  { %v6140_v16 = vpop.eup %6139 }
0x27ac   :  { %5517 = vmatmul.mubr.msk.f32.vlgmr.msra.gmra.mrb[46].mxu0 %vm126_vm3, %v6140_v16 }
0x27ad   :  { %5957 = vmatpush3.bf16.msra.mxu0 %v6293_v6  ;;  %5538 = vmatprep.mubr.msk.f32.mxu0 %vm6242_vm0, %v6241_v1 }
0x27ae   :  { %5958 = vmatprep.subr.bf16.mxu0 %v6240_v0 }
0x27b1   :  { %5960 = vmatpush3.bf16.msra.mxu0 %v6301_v9 }
0x27b2   :  { %5967 = vmatprep.subr.bf16.mxu0 %v6240_v0 }
0x287f   :  { %v3526_v17 = vpop.f32.mrb[46].mxu0 }
0x2880   :  { %v3527_v18 = vadd.f32 %v3526_v17, %v6324_v13  ;;  %v5518_v19 = vpop.f32.mrb[47].mxu0 }
0x2882   :  { %6141 = vtanh.f32 %v3527_v18 }
0x288c   :  { %v6142_v20 = vpop.eup %6141 }
0x288d   :  { %5528 = vmatmul.mubr.msk.f32.vlgmr.msra.gmra.mrb[46].mxu1 %vm126_vm3, %v6142_v20 }
0x288e   :  { %5963 = vmatpush3.bf16.msra.mxu1 %v6293_v6  ;;  %5549 = vmatprep.mubr.msk.f32.mxu1 %vm6242_vm0, %v6241_v1 }
0x288f   :  { %5964 = vmatprep.subr.bf16.mxu1 %v6240_v0 }
0x2892   :  { %5966 = vmatpush3.bf16.msra.mxu1 %v6301_v9 }
0x2893   :  { %5973 = vmatprep.subr.bf16.mxu1 %v6240_v0 }
0x2960   :  { %v3600_v21 = vpop.f32.mrb[46].mxu1 }
0x2961   :  { %v3601_v22 = vadd.f32 %v3600_v21, %v6324_v13  ;;  %v5529_v23 = vpop.f32.mrb[47].mxu1 }
0x2963   :  { %6143 = vtanh.f32 %v3601_v22 }
0x296d   :  { %v6144_v24 = vpop.eup %6143 }
0x296e   :  { %5539 = vmatmul.mubr.msk.f32.vlgmr.msra.gmra.mrb[48].mxu0 %vm126_vm3, %v6144_v24 }
0x296f   :  { %5969 = vmatpush3.bf16.msra.mxu0 %v6293_v6  ;;  %5560 = vmatprep.mubr.msk.f32.mxu0 %vm6242_vm0, %v6241_v1 }
0x2970   :  { %5970 = vmatprep.subr.bf16.mxu0 %v6240_v0 }
0x2973   :  { %5972 = vmatpush3.bf16.msra.mxu0 %v6301_v9 }
0x2974   :  { %5979 = vmatprep.subr.bf16.mxu0 %v6240_v0 }
0x2a41   :  { %v3674_v25 = vpop.f32.mrb[48].mxu0 }
0x2a42   :  { %v3675_v26 = vadd.f32 %v3674_v25, %v6324_v13  ;;  %v5540_v27 = vpop.f32.mrb[49].mxu0 }
0x2a44   :  { %6145 = vtanh.f32 %v3675_v26 }
0x2a4e   :  { %v6146_v28 = vpop.eup %6145 }
0x2a4f   :  { %5550 = vmatmul.mubr.msk.f32.vlgmr.msra.gmra.mrb[48].mxu1 %vm126_vm3, %v6146_v28 }
0x2a50   :  { %5975 = vmatpush3.bf16.msra.mxu1 %v6293_v6  ;;  %5571 = vmatprep.mubr.msk.f32.mxu1 %vm6242_vm0, %v6241_v1 }
0x2a51   :  { %5976 = vmatprep.subr.bf16.mxu1 %v6240_v0 }
0x2a54   :  { %5978 = vmatpush3.bf16.msra.mxu1 %v6301_v9 }
0x2a55   :  { %5985 = vmatprep.subr.bf16.mxu1 %v6240_v0 }
0x2b22   :  { %v3748_v29 = vpop.f32.mrb[48].mxu1 }
0x2b23   :  { %v3749_v30 = vadd.f32 %v3748_v29, %v6324_v13  ;;  %v5551_v31 = vpop.f32.mrb[49].mxu1 }
0x2b25   :  { %6147 = vtanh.f32 %v3749_v30 }
0x2b2f   :  { %v6148_v32 = vpop.eup %6147 }
0x2b30   :  { %5561 = vmatmul.mubr.msk.f32.vlgmr.msra.gmra.mrb[50].mxu0 %vm126_vm3, %v6148_v32 }
0x2b31   :  { %5981 = vmatpush3.bf16.msra.mxu0 %v6293_v6  ;;  %5582 = vmatprep.mubr.msk.f32.mxu0 %vm6242_vm0, %v6241_v1 }
0x2b32   :  { %5982 = vmatprep.subr.bf16.mxu0 %v6240_v0 }
0x2b35   :  { %5984 = vmatpush3.bf16.msra.mxu0 %v6301_v9 }
0x2b36   :  { %5991 = vmatprep.subr.bf16.mxu0 %v6240_v0 }
0x2c03   :  { %v3822_v33 = vpop.f32.mrb[50].mxu0 }
0x2c04   :  { %v3823_v34 = vadd.f32 %v3822_v33, %v6324_v13  ;;  %v5562_v35 = vpop.f32.mrb[51].mxu0 }
0x2c06   :  { %6149 = vtanh.f32 %v3823_v34 }
0x2c10   :  { %v6150_v36 = vpop.eup %6149 }
0x2c11   :  { %5572 = vmatmul.mubr.msk.f32.vlgmr.msra.gmra.mrb[50].mxu1 %vm126_vm3, %v6150_v36 }
0x2c12   :  { %5987 = vmatpush3.bf16.msra.mxu1 %v6293_v6  ;;  %5593 = vmatprep.mubr.msk.f32.mxu1 %vm6242_vm0, %v6241_v1 }
0x2c13   :  { %5988 = vmatprep.subr.bf16.mxu1 %v6240_v0 }
0x2c16   :  { %5990 = vmatpush3.bf16.msra.mxu1 %v6301_v9 }
0x2c17   :  { %5997 = vmatprep.subr.bf16.mxu1 %v6240_v0 }
0x2ce4   :  { %v3896_v37 = vpop.f32.mrb[50].mxu1 }
0x2ce5   :  { %v3897_v38 = vadd.f32 %v3896_v37, %v6324_v13  ;;  %v5573_v39 = vpop.f32.mrb[51].mxu1 }
0x2ce7   :  { %6151 = vtanh.f32 %v3897_v38 }
0x2cf1   :  { %v6152_v40 = vpop.eup %6151 }
0x2cf2   :  { %5583 = vmatmul.mubr.msk.f32.vlgmr.msra.gmra.mrb[52].mxu0 %vm126_vm3, %v6152_v40 }
0x2cf3   :  { %5993 = vmatpush3.bf16.msra.mxu0 %v6293_v6  ;;  %5604 = vmatprep.mubr.msk.f32.mxu0 %vm6242_vm0, %v6241_v1 }
0x2cf4   :  { %5994 = vmatprep.subr.bf16.mxu0 %v6240_v0 }
0x2cf7   :  { %5996 = vmatpush3.bf16.msra.mxu0 %v6301_v9 }
0x2cf8   :  { %6003 = vmatprep.subr.bf16.mxu0 %v6240_v0 }
0x2dc5   :  { %v3970_v41 = vpop.f32.mrb[52].mxu0 }
0x2dc6   :  { %v3971_v42 = vadd.f32 %v3970_v41, %v6324_v13  ;;  %v5584_v43 = vpop.f32.mrb[53].mxu0 }
0x2dc8   :  { %6153 = vtanh.f32 %v3971_v42 }
0x2dd2   :  { %v6154_v44 = vpop.eup %6153 }
0x2dd3   :  { %5594 = vmatmul.mubr.msk.f32.vlgmr.msra.gmra.mrb[52].mxu1 %vm126_vm3, %v6154_v44 }
0x2dd4   :  { %5999 = vmatpush3.bf16.msra.mxu1 %v6293_v6  ;;  %5615 = vmatprep.mubr.msk.f32.mxu1 %vm6242_vm0, %v6241_v1 }
0x2dd5   :  { %6000 = vmatprep.subr.bf16.mxu1 %v6240_v0 }
0x2dd8   :  { %6002 = vmatpush3.bf16.msra.mxu1 %v6301_v9 }
0x2dd9   :  { %6009 = vmatprep.subr.bf16.mxu1 %v6240_v0 }
0x2ea6   :  { %v4044_v45 = vpop.f32.mrb[52].mxu1 }
0x2ea7   :  { %v4045_v46 = vadd.f32 %v4044_v45, %v6324_v13  ;;  %v5595_v47 = vpop.f32.mrb[53].mxu1 }
0x2ea9   :  { %6155 = vtanh.f32 %v4045_v46 }
0x2eb3   :  { %v6156_v48 = vpop.eup %6155 }
0x2eb4   :  { %5605 = vmatmul.mubr.msk.f32.vlgmr.msra.gmra.mrb[54].mxu0 %vm126_vm3, %v6156_v48 }
0x2eb5   :  { %6005 = vmatpush3.bf16.msra.mxu0 %v6293_v6  ;;  %5626 = vmatprep.mubr.msk.f32.mxu0 %vm6242_vm0, %v6241_v1 }
0x2eb6   :  { %6006 = vmatprep.subr.bf16.mxu0 %v6240_v0 }
0x2eb9   :  { %6008 = vmatpush3.bf16.msra.mxu0 %v6301_v9 }
0x2eba   :  { %6015 = vmatprep.subr.bf16.mxu0 %v6240_v0 }
0x2f87   :  { %v4118_v49 = vpop.f32.mrb[54].mxu0 }
0x2f88   :  { %v4119_v50 = vadd.f32 %v4118_v49, %v6324_v13  ;;  %v5606_v51 = vpop.f32.mrb[55].mxu0 }
0x2f8a   :  { %6157 = vtanh.f32 %v4119_v50 }
0x2f94   :  { %v6158_v52 = vpop.eup %6157 }
0x2f95   :  { %5616 = vmatmul.mubr.msk.f32.vlgmr.msra.gmra.mrb[54].mxu1 %vm126_vm3, %v6158_v52 }
0x2f96   :  { %6011 = vmatpush3.bf16.msra.mxu1 %v6293_v6  ;;  %5637 = vmatprep.mubr.msk.f32.mxu1 %vm6242_vm0, %v6241_v1 }
0x2f97   :  { %6012 = vmatprep.subr.bf16.mxu1 %v6240_v0 }
0x2f9a   :  { %6014 = vmatpush3.bf16.msra.mxu1 %v6301_v9 }
0x2f9b   :  { %6021 = vmatprep.subr.bf16.mxu1 %v6240_v0 }
0x3068   :  { %v4192_v53 = vpop.f32.mrb[54].mxu1 }
0x3069   :  { %v4193_v54 = vadd.f32 %v4192_v53, %v6324_v13  ;;  %v5617_v55 = vpop.f32.mrb[55].mxu1 }
0x306b   :  { %6159 = vtanh.f32 %v4193_v54 }
0x3075   :  { %v6160_v56 = vpop.eup %6159 }
0x3076   :  { %5627 = vmatmul.mubr.msk.f32.vlgmr.msra.gmra.mrb[56].mxu0 %vm126_vm3, %v6160_v56 }
0x3077   :  { %6017 = vmatpush3.bf16.msra.mxu0 %v6293_v6  ;;  %5648 = vmatprep.mubr.msk.f32.mxu0 %vm6242_vm0, %v6241_v1 }
0x3078   :  { %6018 = vmatprep.subr.bf16.mxu0 %v6240_v0 }
0x307b   :  { %6020 = vmatpush3.bf16.msra.mxu0 %v6301_v9 }
0x307c   :  { %6027 = vmatprep.subr.bf16.mxu0 %v6240_v0 }
0x3149   :  { %v4266_v57 = vpop.f32.mrb[56].mxu0 }
0x314a   :  { %v4267_v58 = vadd.f32 %v4266_v57, %v6324_v13  ;;  %v5628_v59 = vpop.f32.mrb[57].mxu0 }
0x314c   :  { %6161 = vtanh.f32 %v4267_v58 }
0x3156   :  { %v6162_v60 = vpop.eup %6161 }
0x3157   :  { %5638 = vmatmul.mubr.msk.f32.vlgmr.msra.gmra.mrb[56].mxu1 %vm126_vm3, %v6162_v60 }
0x3158   :  { %6023 = vmatpush3.bf16.msra.mxu1 %v6293_v6  ;;  %5659 = vmatprep.mubr.msk.f32.mxu1 %vm6242_vm0, %v6241_v1 }
0x3159   :  { %6024 = vmatprep.subr.bf16.mxu1 %v6240_v0 }
0x315c   :  { %6026 = vmatpush3.bf16.msra.mxu1 %v6301_v9 }
0x322a   :  { %v4340_v61 = vpop.f32.mrb[56].mxu1 }
0x322b   :  { %v4341_v62 = vadd.f32 %v4340_v61, %v6324_v13  ;;  %v5639_v63 = vpop.f32.mrb[57].mxu1 }
0x322d   :  { %6163 = vtanh.f32 %v4341_v62 }
0x3237   :  { %v6164_v2 = vpop.eup %6163 }
0x3238   :  { %5649 = vmatmul.mubr.msk.f32.vlgmr.msra.gmra.mrb[58].mxu0 %vm126_vm3, %v6164_v2 }
0x3239   :  { %6029 = vmatpush3.bf16.msra.mxu0 %v6293_v6  ;;  %5670 = vmatprep.mubr.msk.f32.mxu0 %vm6242_vm0, %v6241_v1 }
0x323a   :  { %6030 = vmatprep.subr.bf16.mxu0 %v6240_v0 }
0x323d   :  { %6032 = vmatpush3.bf16.msra.mxu0 %v6301_v9 }
0x330b   :  { %v4414_v3 = vpop.f32.mrb[58].mxu0 }
0x330c   :  { %v4415_v4 = vadd.f32 %v4414_v3, %v6324_v13  ;;  %v5650_v5 = vpop.f32.mrb[59].mxu0 }
0x330e   :  { %6165 = vtanh.f32 %v4415_v4 }
0x3318   :  { %v6166_v7 = vpop.eup %6165 }
0x3319   :  { %5660 = vmatmul.mubr.msk.f32.vlgmr.msra.gmra.mrb[58].mxu1 %vm126_vm3, %v6166_v7 }
0x33ec   :  { %v4488_v8 = vpop.f32.mrb[58].mxu1 }
0x33ed   :  { %v4489_v10 = vadd.f32 %v4488_v8, %v6324_v13  ;;  %v5661_v11 = vpop.f32.mrb[59].mxu1 }
0x33ef   :  { %6167 = vtanh.f32 %v4489_v10 }
0x33f9   :  { %v6168_v6 = vpop.eup %6167 }
0x33fa   :  { %5671 = vmatmul.mubr.msk.f32.vlgmr.msra.gmra.mrb[60].mxu0 %vm126_vm3, %v6168_v6 }
0x34cd   :  { %v4562_v1 = vpop.f32.mrb[60].mxu0 }
0x34ce   :  { %v4563_v0 = vadd.f32 %v4562_v1, %v6324_v13  ;;  %v5672_v9 = vpop.f32.mrb[61].mxu0 }
0x34d0   :  { %6169 = vtanh.f32 %v4563_v0 }
0x34da   :  { %v6170_v12 = vpop.eup %6169 }
0x34db   :  { %4613 = vst.msk [vmem:[#allocation6] sm:$0xff] %vm126_vm3, %v6170_v12  ;;  %v4567_v14 = vsub.f32 %v6170_v12, %v6168_v6  ;;  %v4588_v17 = vmul.f32 %v6170_v12, %v6170_v12 }
0x34dd   :  { %v4568_v15 = vmul.f32 %v4567_v14, %v4567_v14  ;;  %v4589_v18 = vsel %vm126_vm3, %v4588_v17, 0.0 }
0x34df   :  { %v4569_v16 = vsel %vm126_vm3, %v4568_v15, 0.0 }
0x34e0   :  { %4570 = vadd.xlane.f32.xlu0 %v4569_v16 }
0x34e4   :  { %4590 = vadd.xlane.f32.xlu0 %v4589_v18 }
0x356d   :  { %v4571_v19 = vpop.xlane.xlu0 %4570 }
0x356e   :  { %v4572_v20 = vrot.slane %v4571_v19, 4 }
0x3570   :  { %v4573_v21 = vadd.f32 %v4572_v20, %v4571_v19 }
0x3571   :  { %v4591_v25 = vpop.xlane.xlu0 %4590 }
0x3572   :  { %v4574_v22 = vrot.slane %v4573_v21, 2  ;;  %v4592_v26 = vrot.slane %v4591_v25, 4 }
0x3574   :  { %v4575_v23 = vadd.f32 %v4574_v22, %v4573_v21  ;;  %v4593_v27 = vadd.f32 %v4592_v26, %v4591_v25 }
0x3576   :  { %v4576_v13 = vrot.slane %v4575_v23, 1  ;;  %v4594_v29 = vrot.slane %v4593_v27, 2 }
0x3578   :  { %v4577_v24 = vadd.f32 %v4576_v13, %v4575_v23  ;;  %v4595_v30 = vadd.f32 %v4594_v29, %v4593_v27 }
0x357a   :  { %6033 = vpush %v4577_v24  ;;  %v4596_v32 = vrot.slane %v4595_v30, 1 }
0x357c   :  { %v4597_v37 = vadd.f32 %v4596_v32, %v4595_v30 }
0x35ab   :  { %s6034_s3 = spop %6033 }
0x35ac   :  { %v4579_v28 = vstv %s6034_s3 }
0x35ad   :  { %6171 = vrsqrt.f32 %v4579_v28  ;;  %vm4582_vm4 = vcmp.eq.f32.partialorder %v4579_v28, inf  ;;  %v4585_v34 = vand.u32 2147483648, %v4579_v28  ;;  %vm4584_vm5 = vcmp.eq.f32.partialorder %v4579_v28, 0.0 }
0x35b7   :  { %v6172_v31 = vpop.eup %6171 }
0x35b8   :  { %v4581_v33 = vmul.f32 %v6172_v31, %v4579_v28 }
0x35ba   :  { %v4583_v35 = vsel %vm4582_vm4, %v4579_v28, %v4581_v33 }
0x35bb   :  { %v4586_v36 = vsel %vm4584_vm5, %v4585_v34, %v4583_v35 }
0x35bc   :  { %6035 = vpush %v4586_v36 }
0x35bd   :  { %6037 = vpush %v4597_v37 }
0x35ed   :  { %s6788_s10 = spop %6035 }
0x35ee   :  { %s6038_s11 = spop %6037 }
0x35ef   :  { %v4599_v38 = vstv %s6038_s11 }
0x35f0   :  { %6173 = vrsqrt.f32 %v4599_v38 }
0x35f1   :  { %6210 = shalt.err (!%p6207_p12)
}
0x35f2   :  { %s6211_s17 = scalar_lea.hbm %s6819_s4, 128 }
0x35f3   :  { %p6212_p13 = scmp.ne.s32.totalorder %s6819_s4, %s6211_s17  ;;  %p6215_p0 = scmp.lt.u32.totalorder %s6211_s17, %s6819_s4 }
0x35f5   :  { %p6217_p1 = pnand %p6215_p0, %p6212_p13 }
0x35f7   :  { %6220 = shalt.err (!%p6217_p1)
}
0x35f8   :  { %4625 = dma.vmem_to_hbm [thread:$0]  %s4623_s13, 128, %s6819_s4, [#allocation4]   ;;  %vm4602_vm6 = vcmp.eq.f32.partialorder %v4599_v38, inf  ;;  %v4605_v41 = vand.u32 2147483648, %v4599_v38  ;;  %vm4604_vm7 = vcmp.eq.f32.partialorder %v4599_v38, 0.0 }
0x35f9   :  { %s6221_s29 = scalar_lea.hbm %s6820_s5, 16 }
0x35fa   :  { %v6174_v39 = vpop.eup %6173  ;;  %p6222_p2 = scmp.ne.s32.totalorder %s6820_s5, %s6221_s29  ;;  %p6225_p3 = scmp.lt.u32.totalorder %s6221_s29, %s6820_s5 }
0x35fb   :  { %v4601_v40 = vmul.f32 %v6174_v39, %v4599_v38 }
0x35fc   :  { %p6227_p4 = pnand %p6225_p3, %p6222_p2 }
0x35fd   :  { %v4603_v42 = vsel %vm4602_vm6, %v4599_v38, %v4601_v40 }
0x35fe   :  { %v4606_v43 = vsel %vm4604_vm7, %v4605_v41, %v4603_v42 }
0x35ff   :  { %6039 = vpush %v4606_v43 }
0x3630   :  { %s6040_s24 = spop %6039 }
0x3631   :  { %s4608_s25 = sadd.f32 1e-08, %s6040_s24 }
0x3633   :  { %v4609_v44 = vstv %s4608_s25 }
0x3634   :  { %6175 = vrcp.f32 %v4609_v44 }
0x363e   :  { %v6176_v45 = vpop.eup %6175 }
0x363f   :  { %6041 = vpush %v6176_v45 }
0x3670   :  { %s6042_s26 = spop %6041 }
0x3671   :  { %s4612_s27 = smul.f32 %s6042_s26, %s6788_s10 }
0x3673   :  { %4615 = sst [smem:[#allocation7]] %s4612_s27 }
0x3674   :  { %6230 = shalt.err (!%p6227_p4)
}
0x3675   :  { %s6244_s8 = smov [#allocation7]  }
0x3676   :  { %4633 = dma.smem_to_hbm %s6244_s8, 16, %s6820_s5, [#allocation5]  }
0x3677   :  { %6233 = dma.done.wait [#allocation4], 128  }
0x3678   :  { %6234 = vsyncadd [#allocation4], 4294967168 }
0x3679   :  { %6235 = dma.done.wait [#allocation5], 16  }
0x367a   :  { %6236 = vsyncadd [#allocation5], 4294967280 }
0x367b   :  { %4640 = sfence }
0x367c   :  { %4641 = vsyncpa [#allocation3], 1 }
0x367d   :  { %4642 = vsyncpa [#allocation4], 1 }
0x367e   :  { %4643 = vsyncpa [#allocation5], 1 }

</bundles_post_ra>
